<compile_context>
chip_gen: v7x
topology: tpu7x:2x2x1
jax: 0.10.0
libtpu: 0.0.40
codegen_flags: <defaults>
</compile_context>

<pallas_src>
import functools

import jax
import jax.numpy as jnp
from jax.experimental import pallas as pl
from jax.experimental.pallas import tpu as pltpu


def _layernorm(z, gamma, beta, eps):
    mu = jnp.mean(z, axis=-1, keepdims=True)
    var = jnp.mean((z - mu) ** 2, axis=-1, keepdims=True)
    return (z - mu) * jax.lax.rsqrt(var + eps) * gamma + beta


def transformer_block_kernel(
    x_ref, wq_ref, wk_ref, wv_ref, wu_ref, bu_ref,
    g1_ref, be1_ref, w1_ref, b1_ref, w2_ref, b2_ref, g2_ref, be2_ref,
    o_ref, acc_ref, *, eps, group, head_dim, ffn_slab,
):
    gi = pl.program_id(1)
    n_groups = pl.num_programs(1)

    x = x_ref[0]                                  # (t, k) f32 (residual path)
    x_bf = x.astype(jnp.bfloat16)                 # MXU operand

    @pl.when(gi == 0)
    def _init():
        acc_ref[...] = jnp.zeros_like(acc_ref)

    # ---- this head-group's attention --------------------------------------
    wq = wq_ref[0]                                # (k, G*k) bf16, 1/sqrt(k) folded in
    wk = wk_ref[0]                                # (k, G*k) bf16
    wv = wv_ref[0]                                # (k, G*k) bf16
    wu = wu_ref[0]                                # (G*k, k) bf16

    # Wide projections: N = G*k keeps the 256-wide MXU (128 on v5e) filled.
    q = jnp.dot(x_bf, wq, preferred_element_type=jnp.float32)     # (t, G*k)
    kk = jnp.dot(x_bf, wk, preferred_element_type=jnp.float32)    # (t, G*k)
    v = jnp.dot(x_bf, wv, preferred_element_type=jnp.float32)     # (t, G*k)

    y_unify = jnp.zeros(acc_ref.shape, jnp.float32)               # (t, k)
    for g in range(group):                        # static unroll over heads in group
        lo = g * head_dim
        hi = lo + head_dim
        qg = q[:, lo:hi].astype(jnp.bfloat16)
        kg = kk[:, lo:hi].astype(jnp.bfloat16)
        vg = v[:, lo:hi].astype(jnp.bfloat16)

        # scores: contract the last dims so K^T is folded into the MXU op.
        s = jax.lax.dot_general(
            qg, kg, dimension_numbers=(((1,), (1,)), ((), ())),
            preferred_element_type=jnp.float32)                   # (t, t)
        s = s - jnp.max(s, axis=-1, keepdims=True)
        p = jnp.exp(s)
        l = jnp.sum(p, axis=-1, keepdims=True)
        # un-normalized p @ v; normalize afterwards with an EUP reciprocal.
        y_g = jnp.dot(p.astype(jnp.bfloat16), vg,
                      preferred_element_type=jnp.float32)          # (t, k)
        # NOTE: approx reciprocal -> ~1e-3 rel error; covered by test tolerance.
        y_g = y_g * pl.reciprocal(l, approx=True)
        # this head's slice of the unify projection (no concat, f32 accumulate).
        y_unify = y_unify + jnp.dot(y_g.astype(jnp.bfloat16), wu[lo:hi, :],
                                    preferred_element_type=jnp.float32)

    acc_ref[...] += y_unify

    # ---- epilogue on the last head-group: unify bias, residuals, LN, FFN ---
    @pl.when(gi == n_groups - 1)
    def _finalize():
        y = acc_ref[...] + bu_ref[...]
        x1 = _layernorm(x + y, g1_ref[...], be1_ref[...], eps)     # (t, k) f32
        x1_bf = x1.astype(jnp.bfloat16)

        hidden = w1_ref.shape[-1]                 # 4*k (static)
        y2 = jnp.zeros(x1.shape, jnp.float32)
        # FFN tiled over the 4k hidden dim: bounds the f32 hidden working set
        # and streams MXU-friendly <=512-wide slabs of W1 / W2.
        for j in range(0, hidden, ffn_slab):
            h1 = jnp.dot(x1_bf, w1_ref[:, j:j + ffn_slab],
                         preferred_element_type=jnp.float32)
            h1 = jnp.maximum(h1 + b1_ref[:, j:j + ffn_slab], 0.0)
            y2 = y2 + jnp.dot(h1.astype(jnp.bfloat16),
                              w2_ref[j:j + ffn_slab, :],
                              preferred_element_type=jnp.float32)
        y2 = y2 + b2_ref[...]

        out = _layernorm(x1 + y2, g2_ref[...], be2_ref[...], eps)
        o_ref[0] = out.astype(o_ref.dtype)


def _pick_group(heads, k):
    """Smallest divisor G of `heads` with G*k >= 256 (MXU N width on v6e/v7x;
    v5e only needs 128, 256 also satisfies it).  Falls back to all heads in a
    single step for tiny problems."""
    for g in range(1, heads + 1):
        if heads % g == 0 and g * k >= 256:
            return g
    return heads


def _vmem_cap_bytes():
    # Cap the scoped VMEM request at 75% of physical VMEM: ~48 MiB on v7x
    # (64 MiB physical), ~96 MiB on v5e/v6e (128 MiB physical).  Conservative,
    # v7x-safe default if the hardware query is unavailable.
    try:
        info = pltpu.get_tpu_info()
        phys = getattr(info, "vmem_capacity_bytes", None)
        if phys:
            return int(phys) * 3 // 4
    except Exception:
        pass
    return 48 * 2 ** 20


def prepare_params(params, *, heads, group=None):
    """One-time (hoisted out of the forward path) weight preparation:
    head-grouped bf16 layout for the MXU, with 1/sqrt(k) folded into Wq."""
    wq, wk, wv, wu, bu, g1, be1, w1, b1, w2, b2, g2, be2 = params
    k = wq.shape[0]
    if group is None:
        group = _pick_group(heads, k)
    assert heads % group == 0
    ng = heads // group
    gk = group * k
    scale = 1.0 / (float(k) ** 0.5)
    mxu = jnp.bfloat16

    # wq/wk/wv: (k, h*k) -> (ng, k, G*k);  wu: (h*k, k) -> (ng, G*k, k).
    wqg = (wq * scale).reshape(k, ng, gk).transpose(1, 0, 2).astype(mxu)
    wkg = wk.reshape(k, ng, gk).transpose(1, 0, 2).astype(mxu)
    wvg = wv.reshape(k, ng, gk).transpose(1, 0, 2).astype(mxu)
    wug = wu.reshape(ng, gk, k).astype(mxu)
    w1b = w1.astype(mxu)
    w2b = w2.astype(mxu)

    weights = (wqg, wkg, wvg, wug,
               bu.astype(jnp.float32), g1.astype(jnp.float32),
               be1.astype(jnp.float32), w1b, b1.astype(jnp.float32),
               w2b, b2.astype(jnp.float32), g2.astype(jnp.float32),
               be2.astype(jnp.float32))
    return {"heads": heads, "group": group, "k": k, "weights": weights}


def _transformer_block_call(x, prepared, *, eps, single_buffer_consts):
    b, t, k = x.shape
    heads = prepared["heads"]
    group = prepared["group"]
    n_groups = heads // group
    gk = group * k
    (wqg, wkg, wvg, wug, bu, g1, be1, w1b, b1, w2b, b2, g2, be2) = prepared["weights"]
    hidden = 4 * k
    # FFN hidden slab: 512-wide (multiple of 128/256 MXU geometry) when it
    # divides 4k, otherwise the whole hidden dim (tiny problems).
    ffn_slab = hidden if (hidden <= 512 or hidden % 512 != 0) else 512

    kernel = functools.partial(
        transformer_block_kernel, eps=eps, group=group, head_dim=k,
        ffn_slab=ffn_slab)

    def const(shape):
        # Constant-index block (same tile every grid step, never re-DMA'd):
        # single-buffer it to halve resident VMEM for W1/W2.
        idx = lambda i, gi: tuple(0 for _ in shape)
        if single_buffer_consts:
            return pl.BlockSpec(shape, idx, pipeline_mode=pl.Buffered(1))
        return pl.BlockSpec(shape, idx)

    def group_w(shape):
        # Per head-group weight slab; default double-buffering hides its DMA
        # behind the per-group compute.  (Raise to pl.Buffered(3) only if a
        # profile shows exposed weight DMA; costs VMEM on v7x.)
        return pl.BlockSpec(shape, lambda i, gi: (gi, 0, 0))

    in_specs = [
        pl.BlockSpec((1, t, k), lambda i, gi: (i, 0, 0)),   # x
        group_w((1, k, gk)),                                # Wq  (ng, k, G*k)
        group_w((1, k, gk)),                                # Wk
        group_w((1, k, gk)),                                # Wv
        group_w((1, gk, k)),                                # Wu  (ng, G*k, k)
        const((1, k)),                                      # bu
        const((1, k)),                                      # gamma1
        const((1, k)),                                      # beta1
        const((k, hidden)),                                 # W1
        const((1, hidden)),                                 # b1
        const((hidden, k)),                                 # W2
        const((1, k)),                                      # b2
        const((1, k)),                                      # gamma2
        const((1, k)),                                      # beta2
    ]

    # --- rough cost / VMEM sizing ------------------------------------------
    flops = b * (
        heads * (3 * 2 * t * k * k          # q/k/v projections
                 + 2 * 2 * t * t * k        # scores + p@v
                 + 2 * t * k * k)           # per-head unify accumulation
        + 2 * (2 * t * k * hidden))         # FFN
    transcendentals = b * heads * (t * t + t)
    weight_bytes = (wqg.size + wkg.size + wvg.size + wug.size
                    + w1b.size + w2b.size) * 2
    small_bytes = (bu.size + b1.size + b2.size
                   + g1.size + be1.size + g2.size + be2.size) * 4
    bytes_accessed = int(2 * b * t * k * 4 + weight_bytes + small_bytes)

    w_bufs = 1 if single_buffer_consts else 2
    vmem_est = (
        3 * t * k * 4                       # x block (dbl-buffered) + out block
        + 4 * k * gk * 2 * 2                # per-group QKV/unify weights (dbl-buffered bf16)
        + w_bufs * 2 * k * hidden * 2       # W1 + W2 resident bf16
        + t * k * 4                         # unify accumulator scratch
        + 3 * t * t * 4                     # score / exp working set
        + 3 * t * gk * 4                    # q/k/v f32 working set
        + 2 * t * ffn_slab * 4              # FFN hidden slab working set
        + 64 * k * 4)                       # bias / LN vectors + headroom
    vmem_limit = int(min(max(2 * vmem_est, 16 * 2 ** 20), _vmem_cap_bytes()))

    return pl.pallas_call(
        kernel,
        out_shape=jax.ShapeDtypeStruct((b, t, k), x.dtype),
        # Head-group axis MUST stay innermost so acc init/finalize brackets
        # each batch element.  Batch is "parallel" (megacore on v7x).
        grid=(b, n_groups),
        in_specs=in_specs,
        out_specs=pl.BlockSpec((1, t, k), lambda i, gi: (i, 0, 0)),
        scratch_shapes=[pltpu.VMEM((t, k), jnp.float32)],
        compiler_params=pltpu.CompilerParams(
            dimension_semantics=("parallel", "arbitrary"),
            vmem_limit_bytes=vmem_limit),
        cost_estimate=pl.CostEstimate(
            flops=flops, transcendentals=transcendentals,
            bytes_accessed=bytes_accessed),
    )(x, wqg, wkg, wvg, wug, bu, g1, be1, w1b, b1, w2b, b2, g2, be2)


def transformer_block(x, prepared, *, eps=1e-5):
    try:
        return _transformer_block_call(x, prepared, eps=eps,
                                       single_buffer_consts=True)
    except Exception:
        # Fallback for jax builds without BlockSpec pipeline_mode support;
        # identical math, constant blocks just stay default double-buffered.
        return _transformer_block_call(x, prepared, eps=eps,
                                       single_buffer_consts=False)


def init_params(key, k, heads):
    ks = jax.random.split(key, 8)
    s = 0.05
    wq = s * jax.random.normal(ks[0], (k, k * heads), jnp.float32)
    wk = s * jax.random.normal(ks[1], (k, k * heads), jnp.float32)
    wv = s * jax.random.normal(ks[2], (k, k * heads), jnp.float32)
    wu = s * jax.random.normal(ks[3], (k * heads, k), jnp.float32)
    bu = s * jax.random.normal(ks[4], (1, k), jnp.float32)
    w1 = s * jax.random.normal(ks[5], (k, 4 * k), jnp.float32)
    b1 = s * jax.random.normal(ks[6], (1, 4 * k), jnp.float32)
    w2 = s * jax.random.normal(ks[7], (4 * k, k), jnp.float32)
    b2 = jnp.zeros((1, k), jnp.float32)
    # LayerNorm params: PyTorch default init (ones / zeros)
    g1 = jnp.ones((1, k), jnp.float32); be1 = jnp.zeros((1, k), jnp.float32)
    g2 = jnp.ones((1, k), jnp.float32); be2 = jnp.zeros((1, k), jnp.float32)
    return (wq, wk, wv, wu, bu, g1, be1, w1, b1, w2, b2, g2, be2)


def reference(x, params, *, heads, eps=1e-5):
    """Pure-JAX f32 mirror of the PyTorch forward, for correctness check."""
    wq, wk, wv, wu, bu, g1, be1, w1, b1, w2, b2, g2, be2 = params
    b, t, k = x.shape
    h = heads

    def split_heads(z):  # (b, t, h*k) -> (b*h, t, k), head-major like torch .view
        return z.reshape(b, t, h, k).transpose(0, 2, 1, 3).reshape(b * h, t, k)

    q = split_heads(x @ wq)
    kk = split_heads(x @ wk)
    v = split_heads(x @ wv)
    w_prime = jnp.einsum("btk,bsk->bts", q, kk) / (k ** 0.5)
    w = jax.nn.softmax(w_prime, axis=2)
    y = jnp.einsum("bts,bsk->btk", w, v)
    y = y.reshape(b, h, t, k).transpose(0, 2, 1, 3).reshape(b, t, h * k)
    y = y @ wu + bu[0]

    def ln(z, g, be):
        mu = jnp.mean(z, -1, keepdims=True)
        var = jnp.mean((z - mu) ** 2, -1, keepdims=True)
        return (z - mu) / jnp.sqrt(var + eps) * g[0] + be[0]

    x1 = ln(x + y, g1, be1)
    ff = jnp.maximum(x1 @ w1 + b1[0], 0.0) @ w2 + b2[0]
    return ln(x1 + ff, g2, be2)


if __name__ == "__main__":
    # NOTE: demo shapes are tiny (k=32 -> masked lane stores; all heads
    # collapse into one grid step).  Validate performance at k >= 256,
    # t >= 512; on v7x keep the batch ("parallel") extent a multiple of 2 so
    # both TensorCores stay busy.
    b, t, k, heads = 2, 8, 32, 4
    key = jax.random.PRNGKey(0)
    kx, kp = jax.random.split(key)
    x = jax.random.normal(kx, (b, t, k), jnp.float32)
    params = init_params(kp, k, heads)

    prepared = prepare_params(params, heads=heads)   # hoisted, one-time weight prep
    out = transformer_block(x, prepared)
    out = jax.block_until_ready(out)

    ref = reference(x, params, heads=heads)
    assert out.shape == (b, t, k)
    err = float(jnp.max(jnp.abs(out - ref)))
    # bf16 MXU operands (f32 accumulation) + approx softmax reciprocal
    # -> tolerance loosened vs the f32 reference.
    assert jnp.allclose(out, ref, atol=2e-2, rtol=2e-2), err
    print("KERNEL_OK")
</pallas_src>

<mosaic_0001>
module attributes {stable_mosaic.version = 11 : i64} {
  func.func @transformer_block_kernel(%arg0: i32, %arg1: i32, %arg2: memref<1x8x32xf32, #tpu.memory_space<vmem>>, %arg3: memref<1x32x128xbf16, #tpu.memory_space<vmem>>, %arg4: memref<1x32x128xbf16, #tpu.memory_space<vmem>>, %arg5: memref<1x32x128xbf16, #tpu.memory_space<vmem>>, %arg6: memref<1x128x32xbf16, #tpu.memory_space<vmem>>, %arg7: memref<1x32xf32, #tpu.memory_space<vmem>>, %arg8: memref<1x32xf32, #tpu.memory_space<vmem>>, %arg9: memref<1x32xf32, #tpu.memory_space<vmem>>, %arg10: memref<32x128xbf16, #tpu.memory_space<vmem>>, %arg11: memref<1x128xf32, #tpu.memory_space<vmem>>, %arg12: memref<128x32xbf16, #tpu.memory_space<vmem>>, %arg13: memref<1x32xf32, #tpu.memory_space<vmem>>, %arg14: memref<1x32xf32, #tpu.memory_space<vmem>>, %arg15: memref<1x32xf32, #tpu.memory_space<vmem>>, %arg16: memref<1x8x32xf32, #tpu.memory_space<vmem>>, %arg17: memref<8x32xf32, #tpu.memory_space<vmem>>) attributes {dimension_semantics = [#tpu.dimension_semantics<parallel>, #tpu.dimension_semantics<arbitrary>], iteration_bounds = array<i64: 2, 1>, scalar_prefetch = 0 : i64, scratch_operands = 1 : i64, tpu.core_type = #tpu.core_type<tc>, window_params = [{transform_indices = @transform_0, window_bounds = array<i64: 1, 8, 32>}, {transform_indices = @transform_1, window_bounds = array<i64: 1, 32, 128>}, {transform_indices = @transform_2, window_bounds = array<i64: 1, 32, 128>}, {transform_indices = @transform_3, window_bounds = array<i64: 1, 32, 128>}, {transform_indices = @transform_4, window_bounds = array<i64: 1, 128, 32>}, {pipeline_mode = #tpu.pipeline_mode<synchronous>, transform_indices = @transform_5, window_bounds = array<i64: 1, 32>}, {pipeline_mode = #tpu.pipeline_mode<synchronous>, transform_indices = @transform_6, window_bounds = array<i64: 1, 32>}, {pipeline_mode = #tpu.pipeline_mode<synchronous>, transform_indices = @transform_7, window_bounds = array<i64: 1, 32>}, {pipeline_mode = #tpu.pipeline_mode<synchronous>, transform_indices = @transform_8, window_bounds = array<i64: 32, 128>}, {pipeline_mode = #tpu.pipeline_mode<synchronous>, transform_indices = @transform_9, window_bounds = array<i64: 1, 128>}, {pipeline_mode = #tpu.pipeline_mode<synchronous>, transform_indices = @transform_10, window_bounds = array<i64: 128, 32>}, {pipeline_mode = #tpu.pipeline_mode<synchronous>, transform_indices = @transform_11, window_bounds = array<i64: 1, 32>}, {pipeline_mode = #tpu.pipeline_mode<synchronous>, transform_indices = @transform_12, window_bounds = array<i64: 1, 32>}, {pipeline_mode = #tpu.pipeline_mode<synchronous>, transform_indices = @transform_13, window_bounds = array<i64: 1, 32>}, {transform_indices = @transform_14, window_bounds = array<i64: 1, 8, 32>}]} {
    %c0 = arith.constant 0 : index
    %c0_0 = arith.constant 0 : index
    %c0_1 = arith.constant 0 : index
    %0 = vector.load %arg2[%c0, %c0_0, %c0_1] : memref<1x8x32xf32, #tpu.memory_space<vmem>>, vector<1x8x32xf32>
    %1 = vector.shape_cast %0 : vector<1x8x32xf32> to vector<8x32xf32>
    %2 = arith.truncf %1 : vector<8x32xf32> to vector<8x32xbf16>
    %c0_i32 = arith.constant 0 : i32
    %3 = arith.cmpi eq, %arg1, %c0_i32 : i32
    %4 = arith.extui %3 : i1 to i32
    %c0_i32_2 = arith.constant 0 : i32
    %5 = arith.cmpi ne, %4, %c0_i32_2 : i32
    scf.if %5 {
      %cst_44 = arith.constant 0.000000e+00 : f32
      %116 = vector.broadcast %cst_44 : f32 to vector<8x32xf32>
      %c0_45 = arith.constant 0 : index
      %c0_46 = arith.constant 0 : index
      %117 = vector.load %arg17[%c0_45, %c0_46] : memref<8x32xf32, #tpu.memory_space<vmem>>, vector<8x32xf32>
      tpu.vector_store %arg17[%c0_45, %c0_46], %116 {strides = array<i32>} : memref<8x32xf32, #tpu.memory_space<vmem>>, vector<8x32xf32>,
    } else {
    }
    %c0_3 = arith.constant 0 : index
    %c0_4 = arith.constant 0 : index
    %c0_5 = arith.constant 0 : index
    %6 = vector.load %arg3[%c0_3, %c0_4, %c0_5] : memref<1x32x128xbf16, #tpu.memory_space<vmem>>, vector<1x32x128xbf16>
    %7 = vector.shape_cast %6 : vector<1x32x128xbf16> to vector<32x128xbf16>
    %c0_6 = arith.constant 0 : index
    %c0_7 = arith.constant 0 : index
    %c0_8 = arith.constant 0 : index
    %8 = vector.load %arg4[%c0_6, %c0_7, %c0_8] : memref<1x32x128xbf16, #tpu.memory_space<vmem>>, vector<1x32x128xbf16>
    %9 = vector.shape_cast %8 : vector<1x32x128xbf16> to vector<32x128xbf16>
    %c0_9 = arith.constant 0 : index
    %c0_10 = arith.constant 0 : index
    %c0_11 = arith.constant 0 : index
    %10 = vector.load %arg5[%c0_9, %c0_10, %c0_11] : memref<1x32x128xbf16, #tpu.memory_space<vmem>>, vector<1x32x128xbf16>
    %11 = vector.shape_cast %10 : vector<1x32x128xbf16> to vector<32x128xbf16>
    %c0_12 = arith.constant 0 : index
    %c0_13 = arith.constant 0 : index
    %c0_14 = arith.constant 0 : index
    %12 = vector.load %arg6[%c0_12, %c0_13, %c0_14] : memref<1x128x32xbf16, #tpu.memory_space<vmem>>, vector<1x128x32xbf16>
    %13 = vector.shape_cast %12 : vector<1x128x32xbf16> to vector<128x32xbf16>
    %cst = arith.constant dense<0.000000e+00> : vector<8x128xf32>
    %14 = tpu.matmul %2, %7, %cst {dimension_numbers = #tpu.dot_dimension_numbers<[1], [0], [0], [1], [0, 0, 1, 1], [], []>} : vector<8x32xbf16>, vector<32x128xbf16>, vector<8x128xf32> -> vector<8x128xf32>
    %cst_15 = arith.constant dense<0.000000e+00> : vector<8x128xf32>
    %15 = tpu.matmul %2, %9, %cst_15 {dimension_numbers = #tpu.dot_dimension_numbers<[1], [0], [0], [1], [0, 0, 1, 1], [], []>} : vector<8x32xbf16>, vector<32x128xbf16>, vector<8x128xf32> -> vector<8x128xf32>
    %cst_16 = arith.constant dense<0.000000e+00> : vector<8x128xf32>
    %16 = tpu.matmul %2, %11, %cst_16 {dimension_numbers = #tpu.dot_dimension_numbers<[1], [0], [0], [1], [0, 0, 1, 1], [], []>} : vector<8x32xbf16>, vector<32x128xbf16>, vector<8x128xf32> -> vector<8x128xf32>
    %cst_17 = arith.constant 0.000000e+00 : f32
    %17 = vector.broadcast %cst_17 : f32 to vector<8x32xf32>
    %18 = vector.extract_strided_slice %14 {offsets = [0, 0], sizes = [8, 32], strides = [1, 1]} : vector<8x128xf32> to vector<8x32xf32>
    %19 = arith.truncf %18 : vector<8x32xf32> to vector<8x32xbf16>
    %20 = vector.extract_strided_slice %15 {offsets = [0, 0], sizes = [8, 32], strides = [1, 1]} : vector<8x128xf32> to vector<8x32xf32>
    %21 = arith.truncf %20 : vector<8x32xf32> to vector<8x32xbf16>
    %22 = vector.extract_strided_slice %16 {offsets = [0, 0], sizes = [8, 32], strides = [1, 1]} : vector<8x128xf32> to vector<8x32xf32>
    %23 = arith.truncf %22 : vector<8x32xf32> to vector<8x32xbf16>
    %cst_18 = arith.constant dense<0.000000e+00> : vector<8x8xf32>
    %24 = tpu.matmul %19, %21, %cst_18 {dimension_numbers = #tpu.dot_dimension_numbers<[1], [1], [0], [0], [0, 0, 1, 0], [], []>} : vector<8x32xbf16>, vector<8x32xbf16>, vector<8x8xf32> -> vector<8x8xf32>
    %cst_19 = arith.constant dense<0xFF800000> : vector<8xf32>
    %25 = vector.multi_reduction <maximumf>, %24, %cst_19 [1] : vector<8x8xf32> to vector<8xf32>
    %26 = vector.shape_cast %25 : vector<8xf32> to vector<8x1xf32>
    %27 = vector.broadcast %26 : vector<8x1xf32> to vector<8x8xf32>
    %28 = arith.subf %24, %27 : vector<8x8xf32>
    %29 = math.exp %28 : vector<8x8xf32>
    %cst_20 = arith.constant dense<0.000000e+00> : vector<8xf32>
    %30 = vector.multi_reduction <add>, %29, %cst_20 [1] : vector<8x8xf32> to vector<8xf32>
    %31 = vector.shape_cast %30 : vector<8xf32> to vector<8x1xf32>
    %32 = arith.truncf %29 : vector<8x8xf32> to vector<8x8xbf16>
    %cst_21 = arith.constant dense<0.000000e+00> : vector<8x32xf32>
    %33 = tpu.matmul %32, %23, %cst_21 {dimension_numbers = #tpu.dot_dimension_numbers<[1], [0], [0], [1], [0, 0, 1, 1], [], []>} : vector<8x8xbf16>, vector<8x32xbf16>, vector<8x32xf32> -> vector<8x32xf32>
    %34 = tpu.reciprocal %31 {approx = true} : vector<8x1xf32> -> vector<8x1xf32>
    %35 = vector.broadcast %34 : vector<8x1xf32> to vector<8x32xf32>
    %36 = arith.mulf %33, %35 : vector<8x32xf32>
    %37 = arith.truncf %36 : vector<8x32xf32> to vector<8x32xbf16>
    %38 = vector.extract_strided_slice %13 {offsets = [0, 0], sizes = [32, 32], strides = [1, 1]} : vector<128x32xbf16> to vector<32x32xbf16>
    %cst_22 = arith.constant dense<0.000000e+00> : vector<8x32xf32>
    %39 = tpu.matmul %37, %38, %cst_22 {dimension_numbers = #tpu.dot_dimension_numbers<[1], [0], [0], [1], [0, 0, 1, 1], [], []>} : vector<8x32xbf16>, vector<32x32xbf16>, vector<8x32xf32> -> vector<8x32xf32>
    %40 = arith.addf %17, %39 : vector<8x32xf32>
    %41 = vector.extract_strided_slice %14 {offsets = [0, 32], sizes = [8, 32], strides = [1, 1]} : vector<8x128xf32> to vector<8x32xf32>
    %42 = arith.truncf %41 : vector<8x32xf32> to vector<8x32xbf16>
    %43 = vector.extract_strided_slice %15 {offsets = [0, 32], sizes = [8, 32], strides = [1, 1]} : vector<8x128xf32> to vector<8x32xf32>
    %44 = arith.truncf %43 : vector<8x32xf32> to vector<8x32xbf16>
    %45 = vector.extract_strided_slice %16 {offsets = [0, 32], sizes = [8, 32], strides = [1, 1]} : vector<8x128xf32> to vector<8x32xf32>
    %46 = arith.truncf %45 : vector<8x32xf32> to vector<8x32xbf16>
    %cst_23 = arith.constant dense<0.000000e+00> : vector<8x8xf32>
    %47 = tpu.matmul %42, %44, %cst_23 {dimension_numbers = #tpu.dot_dimension_numbers<[1], [1], [0], [0], [0, 0, 1, 0], [], []>} : vector<8x32xbf16>, vector<8x32xbf16>, vector<8x8xf32> -> vector<8x8xf32>
    %cst_24 = arith.constant dense<0xFF800000> : vector<8xf32>
    %48 = vector.multi_reduction <maximumf>, %47, %cst_24 [1] : vector<8x8xf32> to vector<8xf32>
    %49 = vector.shape_cast %48 : vector<8xf32> to vector<8x1xf32>
    %50 = vector.broadcast %49 : vector<8x1xf32> to vector<8x8xf32>
    %51 = arith.subf %47, %50 : vector<8x8xf32>
    %52 = math.exp %51 : vector<8x8xf32>
    %cst_25 = arith.constant dense<0.000000e+00> : vector<8xf32>
    %53 = vector.multi_reduction <add>, %52, %cst_25 [1] : vector<8x8xf32> to vector<8xf32>
    %54 = vector.shape_cast %53 : vector<8xf32> to vector<8x1xf32>
    %55 = arith.truncf %52 : vector<8x8xf32> to vector<8x8xbf16>
    %cst_26 = arith.constant dense<0.000000e+00> : vector<8x32xf32>
    %56 = tpu.matmul %55, %46, %cst_26 {dimension_numbers = #tpu.dot_dimension_numbers<[1], [0], [0], [1], [0, 0, 1, 1], [], []>} : vector<8x8xbf16>, vector<8x32xbf16>, vector<8x32xf32> -> vector<8x32xf32>
    %57 = tpu.reciprocal %54 {approx = true} : vector<8x1xf32> -> vector<8x1xf32>
    %58 = vector.broadcast %57 : vector<8x1xf32> to vector<8x32xf32>
    %59 = arith.mulf %56, %58 : vector<8x32xf32>
    %60 = arith.truncf %59 : vector<8x32xf32> to vector<8x32xbf16>
    %61 = vector.extract_strided_slice %13 {offsets = [32, 0], sizes = [32, 32], strides = [1, 1]} : vector<128x32xbf16> to vector<32x32xbf16>
    %cst_27 = arith.constant dense<0.000000e+00> : vector<8x32xf32>
    %62 = tpu.matmul %60, %61, %cst_27 {dimension_numbers = #tpu.dot_dimension_numbers<[1], [0], [0], [1], [0, 0, 1, 1], [], []>} : vector<8x32xbf16>, vector<32x32xbf16>, vector<8x32xf32> -> vector<8x32xf32>
    %63 = arith.addf %40, %62 : vector<8x32xf32>
    %64 = vector.extract_strided_slice %14 {offsets = [0, 64], sizes = [8, 32], strides = [1, 1]} : vector<8x128xf32> to vector<8x32xf32>
    %65 = arith.truncf %64 : vector<8x32xf32> to vector<8x32xbf16>
    %66 = vector.extract_strided_slice %15 {offsets = [0, 64], sizes = [8, 32], strides = [1, 1]} : vector<8x128xf32> to vector<8x32xf32>
    %67 = arith.truncf %66 : vector<8x32xf32> to vector<8x32xbf16>
    %68 = vector.extract_strided_slice %16 {offsets = [0, 64], sizes = [8, 32], strides = [1, 1]} : vector<8x128xf32> to vector<8x32xf32>
    %69 = arith.truncf %68 : vector<8x32xf32> to vector<8x32xbf16>
    %cst_28 = arith.constant dense<0.000000e+00> : vector<8x8xf32>
    %70 = tpu.matmul %65, %67, %cst_28 {dimension_numbers = #tpu.dot_dimension_numbers<[1], [1], [0], [0], [0, 0, 1, 0], [], []>} : vector<8x32xbf16>, vector<8x32xbf16>, vector<8x8xf32> -> vector<8x8xf32>
    %cst_29 = arith.constant dense<0xFF800000> : vector<8xf32>
    %71 = vector.multi_reduction <maximumf>, %70, %cst_29 [1] : vector<8x8xf32> to vector<8xf32>
    %72 = vector.shape_cast %71 : vector<8xf32> to vector<8x1xf32>
    %73 = vector.broadcast %72 : vector<8x1xf32> to vector<8x8xf32>
    %74 = arith.subf %70, %73 : vector<8x8xf32>
    %75 = math.exp %74 : vector<8x8xf32>
    %cst_30 = arith.constant dense<0.000000e+00> : vector<8xf32>
    %76 = vector.multi_reduction <add>, %75, %cst_30 [1] : vector<8x8xf32> to vector<8xf32>
    %77 = vector.shape_cast %76 : vector<8xf32> to vector<8x1xf32>
    %78 = arith.truncf %75 : vector<8x8xf32> to vector<8x8xbf16>
    %cst_31 = arith.constant dense<0.000000e+00> : vector<8x32xf32>
    %79 = tpu.matmul %78, %69, %cst_31 {dimension_numbers = #tpu.dot_dimension_numbers<[1], [0], [0], [1], [0, 0, 1, 1], [], []>} : vector<8x8xbf16>, vector<8x32xbf16>, vector<8x32xf32> -> vector<8x32xf32>
    %80 = tpu.reciprocal %77 {approx = true} : vector<8x1xf32> -> vector<8x1xf32>
    %81 = vector.broadcast %80 : vector<8x1xf32> to vector<8x32xf32>
    %82 = arith.mulf %79, %81 : vector<8x32xf32>
    %83 = arith.truncf %82 : vector<8x32xf32> to vector<8x32xbf16>
    %84 = vector.extract_strided_slice %13 {offsets = [64, 0], sizes = [32, 32], strides = [1, 1]} : vector<128x32xbf16> to vector<32x32xbf16>
    %cst_32 = arith.constant dense<0.000000e+00> : vector<8x32xf32>
    %85 = tpu.matmul %83, %84, %cst_32 {dimension_numbers = #tpu.dot_dimension_numbers<[1], [0], [0], [1], [0, 0, 1, 1], [], []>} : vector<8x32xbf16>, vector<32x32xbf16>, vector<8x32xf32> -> vector<8x32xf32>
    %86 = arith.addf %63, %85 : vector<8x32xf32>
    %87 = vector.extract_strided_slice %14 {offsets = [0, 96], sizes = [8, 32], strides = [1, 1]} : vector<8x128xf32> to vector<8x32xf32>
    %88 = arith.truncf %87 : vector<8x32xf32> to vector<8x32xbf16>
    %89 = vector.extract_strided_slice %15 {offsets = [0, 96], sizes = [8, 32], strides = [1, 1]} : vector<8x128xf32> to vector<8x32xf32>
    %90 = arith.truncf %89 : vector<8x32xf32> to vector<8x32xbf16>
    %91 = vector.extract_strided_slice %16 {offsets = [0, 96], sizes = [8, 32], strides = [1, 1]} : vector<8x128xf32> to vector<8x32xf32>
    %92 = arith.truncf %91 : vector<8x32xf32> to vector<8x32xbf16>
    %cst_33 = arith.constant dense<0.000000e+00> : vector<8x8xf32>
    %93 = tpu.matmul %88, %90, %cst_33 {dimension_numbers = #tpu.dot_dimension_numbers<[1], [1], [0], [0], [0, 0, 1, 0], [], []>} : vector<8x32xbf16>, vector<8x32xbf16>, vector<8x8xf32> -> vector<8x8xf32>
    %cst_34 = arith.constant dense<0xFF800000> : vector<8xf32>
    %94 = vector.multi_reduction <maximumf>, %93, %cst_34 [1] : vector<8x8xf32> to vector<8xf32>
    %95 = vector.shape_cast %94 : vector<8xf32> to vector<8x1xf32>
    %96 = vector.broadcast %95 : vector<8x1xf32> to vector<8x8xf32>
    %97 = arith.subf %93, %96 : vector<8x8xf32>
    %98 = math.exp %97 : vector<8x8xf32>
    %cst_35 = arith.constant dense<0.000000e+00> : vector<8xf32>
    %99 = vector.multi_reduction <add>, %98, %cst_35 [1] : vector<8x8xf32> to vector<8xf32>
    %100 = vector.shape_cast %99 : vector<8xf32> to vector<8x1xf32>
    %101 = arith.truncf %98 : vector<8x8xf32> to vector<8x8xbf16>
    %cst_36 = arith.constant dense<0.000000e+00> : vector<8x32xf32>
    %102 = tpu.matmul %101, %92, %cst_36 {dimension_numbers = #tpu.dot_dimension_numbers<[1], [0], [0], [1], [0, 0, 1, 1], [], []>} : vector<8x8xbf16>, vector<8x32xbf16>, vector<8x32xf32> -> vector<8x32xf32>
    %103 = tpu.reciprocal %100 {approx = true} : vector<8x1xf32> -> vector<8x1xf32>
    %104 = vector.broadcast %103 : vector<8x1xf32> to vector<8x32xf32>
    %105 = arith.mulf %102, %104 : vector<8x32xf32>
    %106 = arith.truncf %105 : vector<8x32xf32> to vector<8x32xbf16>
    %107 = vector.extract_strided_slice %13 {offsets = [96, 0], sizes = [32, 32], strides = [1, 1]} : vector<128x32xbf16> to vector<32x32xbf16>
    %cst_37 = arith.constant dense<0.000000e+00> : vector<8x32xf32>
    %108 = tpu.matmul %106, %107, %cst_37 {dimension_numbers = #tpu.dot_dimension_numbers<[1], [0], [0], [1], [0, 0, 1, 1], [], []>} : vector<8x32xbf16>, vector<32x32xbf16>, vector<8x32xf32> -> vector<8x32xf32>
    %109 = arith.addf %86, %108 : vector<8x32xf32>
    %c0_38 = arith.constant 0 : index
    %c0_39 = arith.constant 0 : index
    %110 = vector.load %arg17[%c0_38, %c0_39] : memref<8x32xf32, #tpu.memory_space<vmem>>, vector<8x32xf32>
    %111 = arith.addf %110, %109 : vector<8x32xf32>
    %c0_40 = arith.constant 0 : index
    %c0_41 = arith.constant 0 : index
    %112 = vector.load %arg17[%c0_40, %c0_41] : memref<8x32xf32, #tpu.memory_space<vmem>>, vector<8x32xf32>
    tpu.vector_store %arg17[%c0_40, %c0_41], %111 {strides = array<i32>} : memref<8x32xf32, #tpu.memory_space<vmem>>, vector<8x32xf32>,
    %c0_i32_42 = arith.constant 0 : i32
    %113 = arith.cmpi eq, %arg1, %c0_i32_42 : i32
    %114 = arith.extui %113 : i1 to i32
    %c0_i32_43 = arith.constant 0 : i32
    %115 = arith.cmpi ne, %114, %c0_i32_43 : i32
    scf.if %115 {
      %c0_44 = arith.constant 0 : index
      %c0_45 = arith.constant 0 : index
      %116 = vector.load %arg17[%c0_44, %c0_45] : memref<8x32xf32, #tpu.memory_space<vmem>>, vector<8x32xf32>
      %c0_46 = arith.constant 0 : index
      %c0_47 = arith.constant 0 : index
      %117 = vector.load %arg7[%c0_46, %c0_47] : memref<1x32xf32, #tpu.memory_space<vmem>>, vector<1x32xf32>
      %118 = vector.broadcast %117 : vector<1x32xf32> to vector<8x32xf32>
      %119 = arith.addf %116, %118 : vector<8x32xf32>
      %120 = arith.addf %1, %119 : vector<8x32xf32>
      %c0_48 = arith.constant 0 : index
      %c0_49 = arith.constant 0 : index
      %121 = vector.load %arg8[%c0_48, %c0_49] : memref<1x32xf32, #tpu.memory_space<vmem>>, vector<1x32xf32>
      %c0_50 = arith.constant 0 : index
      %c0_51 = arith.constant 0 : index
      %122 = vector.load %arg9[%c0_50, %c0_51] : memref<1x32xf32, #tpu.memory_space<vmem>>, vector<1x32xf32>
      %cst_52 = arith.constant dense<0.000000e+00> : vector<8xf32>
      %123 = vector.multi_reduction <add>, %120, %cst_52 [1] : vector<8x32xf32> to vector<8xf32>
      %124 = vector.shape_cast %123 : vector<8xf32> to vector<8x1xf32>
      %cst_53 = arith.constant 3.200000e+01 : f32
      %125 = vector.broadcast %cst_53 : f32 to vector<8x1xf32>
      %126 = arith.divf %124, %125 : vector<8x1xf32>
      %127 = vector.broadcast %126 : vector<8x1xf32> to vector<8x32xf32>
      %128 = arith.subf %120, %127 : vector<8x32xf32>
      %129 = arith.mulf %128, %128 : vector<8x32xf32>
      %cst_54 = arith.constant dense<0.000000e+00> : vector<8xf32>
      %130 = vector.multi_reduction <add>, %129, %cst_54 [1] : vector<8x32xf32> to vector<8xf32>
      %131 = vector.shape_cast %130 : vector<8xf32> to vector<8x1xf32>
      %cst_55 = arith.constant 3.200000e+01 : f32
      %132 = vector.broadcast %cst_55 : f32 to vector<8x1xf32>
      %133 = arith.divf %131, %132 : vector<8x1xf32>
      %134 = vector.broadcast %126 : vector<8x1xf32> to vector<8x32xf32>
      %135 = arith.subf %120, %134 : vector<8x32xf32>
      %cst_56 = arith.constant 9.99999974E-6 : f32
      %136 = vector.broadcast %cst_56 : f32 to vector<8x1xf32>
      %137 = arith.addf %133, %136 : vector<8x1xf32>
      %138 = math.rsqrt %137 : vector<8x1xf32>
      %139 = vector.broadcast %138 : vector<8x1xf32> to vector<8x32xf32>
      %140 = arith.mulf %135, %139 : vector<8x32xf32>
      %141 = vector.broadcast %121 : vector<1x32xf32> to vector<8x32xf32>
      %142 = arith.mulf %140, %141 : vector<8x32xf32>
      %143 = vector.broadcast %122 : vector<1x32xf32> to vector<8x32xf32>
      %144 = arith.addf %142, %143 : vector<8x32xf32>
      %145 = arith.truncf %144 : vector<8x32xf32> to vector<8x32xbf16>
      %cst_57 = arith.constant 0.000000e+00 : f32
      %146 = vector.broadcast %cst_57 : f32 to vector<8x32xf32>
      %c0_58 = arith.constant 0 : index
      %c0_59 = arith.constant 0 : index
      %147 = vector.load %arg10[%c0_58, %c0_59] : memref<32x128xbf16, #tpu.memory_space<vmem>>, vector<32x128xbf16>
      %cst_60 = arith.constant dense<0.000000e+00> : vector<8x128xf32>
      %148 = tpu.matmul %145, %147, %cst_60 {dimension_numbers = #tpu.dot_dimension_numbers<[1], [0], [0], [1], [0, 0, 1, 1], [], []>} : vector<8x32xbf16>, vector<32x128xbf16>, vector<8x128xf32> -> vector<8x128xf32>
      %c0_61 = arith.constant 0 : index
      %c0_62 = arith.constant 0 : index
      %149 = vector.load %arg11[%c0_61, %c0_62] : memref<1x128xf32, #tpu.memory_space<vmem>>, vector<1x128xf32>
      %150 = vector.broadcast %149 : vector<1x128xf32> to vector<8x128xf32>
      %151 = arith.addf %148, %150 : vector<8x128xf32>
      %cst_63 = arith.constant 0.000000e+00 : f32
      %152 = vector.broadcast %cst_63 : f32 to vector<8x128xf32>
      %153 = arith.maximumf %151, %152 : vector<8x128xf32>
      %154 = arith.truncf %153 : vector<8x128xf32> to vector<8x128xbf16>
      %c0_64 = arith.constant 0 : index
      %c0_65 = arith.constant 0 : index
      %155 = vector.load %arg12[%c0_64, %c0_65] : memref<128x32xbf16, #tpu.memory_space<vmem>>, vector<128x32xbf16>
      %cst_66 = arith.constant dense<0.000000e+00> : vector<8x32xf32>
      %156 = tpu.matmul %154, %155, %cst_66 {dimension_numbers = #tpu.dot_dimension_numbers<[1], [0], [0], [1], [0, 0, 1, 1], [], []>} : vector<8x128xbf16>, vector<128x32xbf16>, vector<8x32xf32> -> vector<8x32xf32>
      %157 = arith.addf %146, %156 : vector<8x32xf32>
      %c0_67 = arith.constant 0 : index
      %c0_68 = arith.constant 0 : index
      %158 = vector.load %arg13[%c0_67, %c0_68] : memref<1x32xf32, #tpu.memory_space<vmem>>, vector<1x32xf32>
      %159 = vector.broadcast %158 : vector<1x32xf32> to vector<8x32xf32>
      %160 = arith.addf %157, %159 : vector<8x32xf32>
      %161 = arith.addf %144, %160 : vector<8x32xf32>
      %c0_69 = arith.constant 0 : index
      %c0_70 = arith.constant 0 : index
      %162 = vector.load %arg14[%c0_69, %c0_70] : memref<1x32xf32, #tpu.memory_space<vmem>>, vector<1x32xf32>
      %c0_71 = arith.constant 0 : index
      %c0_72 = arith.constant 0 : index
      %163 = vector.load %arg15[%c0_71, %c0_72] : memref<1x32xf32, #tpu.memory_space<vmem>>, vector<1x32xf32>
      %cst_73 = arith.constant dense<0.000000e+00> : vector<8xf32>
      %164 = vector.multi_reduction <add>, %161, %cst_73 [1] : vector<8x32xf32> to vector<8xf32>
      %165 = vector.shape_cast %164 : vector<8xf32> to vector<8x1xf32>
      %cst_74 = arith.constant 3.200000e+01 : f32
      %166 = vector.broadcast %cst_74 : f32 to vector<8x1xf32>
      %167 = arith.divf %165, %166 : vector<8x1xf32>
      %168 = vector.broadcast %167 : vector<8x1xf32> to vector<8x32xf32>
      %169 = arith.subf %161, %168 : vector<8x32xf32>
      %170 = arith.mulf %169, %169 : vector<8x32xf32>
      %cst_75 = arith.constant dense<0.000000e+00> : vector<8xf32>
      %171 = vector.multi_reduction <add>, %170, %cst_75 [1] : vector<8x32xf32> to vector<8xf32>
      %172 = vector.shape_cast %171 : vector<8xf32> to vector<8x1xf32>
      %cst_76 = arith.constant 3.200000e+01 : f32
      %173 = vector.broadcast %cst_76 : f32 to vector<8x1xf32>
      %174 = arith.divf %172, %173 : vector<8x1xf32>
      %175 = vector.broadcast %167 : vector<8x1xf32> to vector<8x32xf32>
      %176 = arith.subf %161, %175 : vector<8x32xf32>
      %cst_77 = arith.constant 9.99999974E-6 : f32
      %177 = vector.broadcast %cst_77 : f32 to vector<8x1xf32>
      %178 = arith.addf %174, %177 : vector<8x1xf32>
      %179 = math.rsqrt %178 : vector<8x1xf32>
      %180 = vector.broadcast %179 : vector<8x1xf32> to vector<8x32xf32>
      %181 = arith.mulf %176, %180 : vector<8x32xf32>
      %182 = vector.broadcast %162 : vector<1x32xf32> to vector<8x32xf32>
      %183 = arith.mulf %181, %182 : vector<8x32xf32>
      %184 = vector.broadcast %163 : vector<1x32xf32> to vector<8x32xf32>
      %185 = arith.addf %183, %184 : vector<8x32xf32>
      %c0_78 = arith.constant 0 : index
      %c0_79 = arith.constant 0 : index
      %c0_80 = arith.constant 0 : index
      %186 = vector.load %arg16[%c0_78, %c0_79, %c0_80] : memref<1x8x32xf32, #tpu.memory_space<vmem>>, vector<1x8x32xf32>
      %187 = vector.shape_cast %186 : vector<1x8x32xf32> to vector<8x32xf32>
      %188 = vector.shape_cast %185 : vector<8x32xf32> to vector<1x8x32xf32>
      tpu.vector_store %arg16[%c0_78, %c0_79, %c0_80], %188 {strides = array<i32>} : memref<1x8x32xf32, #tpu.memory_space<vmem>>, vector<1x8x32xf32>,
    } else {
    }
    return
  }
  func.func @transform_0(%arg0: i32, %arg1: i32) -> (i32, i32, i32) {
    %c0_i32 = arith.constant 0 : i32
    %c0_i32_0 = arith.constant 0 : i32
    %c0_i32_1 = arith.constant 0 : i32
    return %arg0, %c0_i32, %c0_i32_0 : i32, i32, i32
  }
  func.func @transform_1(%arg0: i32, %arg1: i32) -> (i32, i32, i32) {
    %c0_i32 = arith.constant 0 : i32
    %c0_i32_0 = arith.constant 0 : i32
    %c0_i32_1 = arith.constant 0 : i32
    return %arg1, %c0_i32, %c0_i32_0 : i32, i32, i32
  }
  func.func @transform_2(%arg0: i32, %arg1: i32) -> (i32, i32, i32) {
    %c0_i32 = arith.constant 0 : i32
    %c0_i32_0 = arith.constant 0 : i32
    %c0_i32_1 = arith.constant 0 : i32
    return %arg1, %c0_i32, %c0_i32_0 : i32, i32, i32
  }
  func.func @transform_3(%arg0: i32, %arg1: i32) -> (i32, i32, i32) {
    %c0_i32 = arith.constant 0 : i32
    %c0_i32_0 = arith.constant 0 : i32
    %c0_i32_1 = arith.constant 0 : i32
    return %arg1, %c0_i32, %c0_i32_0 : i32, i32, i32
  }
  func.func @transform_4(%arg0: i32, %arg1: i32) -> (i32, i32, i32) {
    %c0_i32 = arith.constant 0 : i32
    %c0_i32_0 = arith.constant 0 : i32
    %c0_i32_1 = arith.constant 0 : i32
    return %arg1, %c0_i32, %c0_i32_0 : i32, i32, i32
  }
  func.func @transform_5(%arg0: i32, %arg1: i32) -> (i32, i32) {
    %c0_i32 = arith.constant 0 : i32
    %c0_i32_0 = arith.constant 0 : i32
    %c0_i32_1 = arith.constant 0 : i32
    return %c0_i32, %c0_i32_0 : i32, i32
  }
  func.func @transform_6(%arg0: i32, %arg1: i32) -> (i32, i32) {
    %c0_i32 = arith.constant 0 : i32
    %c0_i32_0 = arith.constant 0 : i32
    %c0_i32_1 = arith.constant 0 : i32
    return %c0_i32, %c0_i32_0 : i32, i32
  }
  func.func @transform_7(%arg0: i32, %arg1: i32) -> (i32, i32) {
    %c0_i32 = arith.constant 0 : i32
    %c0_i32_0 = arith.constant 0 : i32
    %c0_i32_1 = arith.constant 0 : i32
    return %c0_i32, %c0_i32_0 : i32, i32
  }
  func.func @transform_8(%arg0: i32, %arg1: i32) -> (i32, i32) {
    %c0_i32 = arith.constant 0 : i32
    %c0_i32_0 = arith.constant 0 : i32
    %c0_i32_1 = arith.constant 0 : i32
    return %c0_i32, %c0_i32_0 : i32, i32
  }
  func.func @transform_9(%arg0: i32, %arg1: i32) -> (i32, i32) {
    %c0_i32 = arith.constant 0 : i32
    %c0_i32_0 = arith.constant 0 : i32
    %c0_i32_1 = arith.constant 0 : i32
    return %c0_i32, %c0_i32_0 : i32, i32
  }
  func.func @transform_10(%arg0: i32, %arg1: i32) -> (i32, i32) {
    %c0_i32 = arith.constant 0 : i32
    %c0_i32_0 = arith.constant 0 : i32
    %c0_i32_1 = arith.constant 0 : i32
    return %c0_i32, %c0_i32_0 : i32, i32
  }
  func.func @transform_11(%arg0: i32, %arg1: i32) -> (i32, i32) {
    %c0_i32 = arith.constant 0 : i32
    %c0_i32_0 = arith.constant 0 : i32
    %c0_i32_1 = arith.constant 0 : i32
    return %c0_i32, %c0_i32_0 : i32, i32
  }
  func.func @transform_12(%arg0: i32, %arg1: i32) -> (i32, i32) {
    %c0_i32 = arith.constant 0 : i32
    %c0_i32_0 = arith.constant 0 : i32
    %c0_i32_1 = arith.constant 0 : i32
    return %c0_i32, %c0_i32_0 : i32, i32
  }
  func.func @transform_13(%arg0: i32, %arg1: i32) -> (i32, i32) {
    %c0_i32 = arith.constant 0 : i32
    %c0_i32_0 = arith.constant 0 : i32
    %c0_i32_1 = arith.constant 0 : i32
    return %c0_i32, %c0_i32_0 : i32, i32
  }
  func.func @transform_14(%arg0: i32, %arg1: i32) -> (i32, i32, i32) {
    %c0_i32 = arith.constant 0 : i32
    %c0_i32_0 = arith.constant 0 : i32
    %c0_i32_1 = arith.constant 0 : i32
    return %arg0, %c0_i32, %c0_i32_0 : i32, i32, i32
  }
}

module attributes {stable_mosaic.version = 11 : i64} {
  func.func @transformer_block_kernel(%arg0: i32, %arg1: i32, %arg2: memref<1x8x32xf32, #tpu.memory_space<vmem>>, %arg3: memref<1x32x128xbf16, #tpu.memory_space<vmem>>, %arg4: memref<1x32x128xbf16, #tpu.memory_space<vmem>>, %arg5: memref<1x32x128xbf16, #tpu.memory_space<vmem>>, %arg6: memref<1x128x32xbf16, #tpu.memory_space<vmem>>, %arg7: memref<1x32xf32, #tpu.memory_space<vmem>>, %arg8: memref<1x32xf32, #tpu.memory_space<vmem>>, %arg9: memref<1x32xf32, #tpu.memory_space<vmem>>, %arg10: memref<32x128xbf16, #tpu.memory_space<vmem>>, %arg11: memref<1x128xf32, #tpu.memory_space<vmem>>, %arg12: memref<128x32xbf16, #tpu.memory_space<vmem>>, %arg13: memref<1x32xf32, #tpu.memory_space<vmem>>, %arg14: memref<1x32xf32, #tpu.memory_space<vmem>>, %arg15: memref<1x32xf32, #tpu.memory_space<vmem>>, %arg16: memref<1x8x32xf32, #tpu.memory_space<vmem>>, %arg17: memref<8x32xf32, #tpu.memory_space<vmem>>) attributes {dimension_semantics = [#tpu.dimension_semantics<parallel>, #tpu.dimension_semantics<arbitrary>], iteration_bounds = array<i64: 2, 1>, scalar_prefetch = 0 : i64, scratch_operands = 1 : i64, tpu.core_type = #tpu.core_type<tc>, window_params = [{transform_indices = @transform_0, window_bounds = array<i64: 1, 8, 32>}, {transform_indices = @transform_1, window_bounds = array<i64: 1, 32, 128>}, {transform_indices = @transform_2, window_bounds = array<i64: 1, 32, 128>}, {transform_indices = @transform_3, window_bounds = array<i64: 1, 32, 128>}, {transform_indices = @transform_4, window_bounds = array<i64: 1, 128, 32>}, {pipeline_mode = #tpu.pipeline_mode<synchronous>, transform_indices = @transform_5, window_bounds = array<i64: 1, 32>}, {pipeline_mode = #tpu.pipeline_mode<synchronous>, transform_indices = @transform_6, window_bounds = array<i64: 1, 32>}, {pipeline_mode = #tpu.pipeline_mode<synchronous>, transform_indices = @transform_7, window_bounds = array<i64: 1, 32>}, {pipeline_mode = #tpu.pipeline_mode<synchronous>, transform_indices = @transform_8, window_bounds = array<i64: 32, 128>}, {pipeline_mode = #tpu.pipeline_mode<synchronous>, transform_indices = @transform_9, window_bounds = array<i64: 1, 128>}, {pipeline_mode = #tpu.pipeline_mode<synchronous>, transform_indices = @transform_10, window_bounds = array<i64: 128, 32>}, {pipeline_mode = #tpu.pipeline_mode<synchronous>, transform_indices = @transform_11, window_bounds = array<i64: 1, 32>}, {pipeline_mode = #tpu.pipeline_mode<synchronous>, transform_indices = @transform_12, window_bounds = array<i64: 1, 32>}, {pipeline_mode = #tpu.pipeline_mode<synchronous>, transform_indices = @transform_13, window_bounds = array<i64: 1, 32>}, {transform_indices = @transform_14, window_bounds = array<i64: 1, 8, 32>}]} {
    %c0 = arith.constant 0 : index
    %c0_0 = arith.constant 0 : index
    %c0_1 = arith.constant 0 : index
    %0 = vector.load %arg2[%c0, %c0_0, %c0_1] : memref<1x8x32xf32, #tpu.memory_space<vmem>>, vector<1x8x32xf32>
    %1 = vector.shape_cast %0 : vector<1x8x32xf32> to vector<8x32xf32>
    %2 = arith.truncf %1 : vector<8x32xf32> to vector<8x32xbf16>
    %c0_i32 = arith.constant 0 : i32
    %3 = arith.cmpi eq, %arg1, %c0_i32 : i32
    %4 = arith.extui %3 : i1 to i32
    %c0_i32_2 = arith.constant 0 : i32
    %5 = arith.cmpi ne, %4, %c0_i32_2 : i32
    scf.if %5 {
      %cst_44 = arith.constant 0.000000e+00 : f32
      %116 = vector.broadcast %cst_44 : f32 to vector<8x32xf32>
      %c0_45 = arith.constant 0 : index
      %c0_46 = arith.constant 0 : index
      %117 = vector.load %arg17[%c0_45, %c0_46] : memref<8x32xf32, #tpu.memory_space<vmem>>, vector<8x32xf32>
      tpu.vector_store %arg17[%c0_45, %c0_46], %116 {strides = array<i32>} : memref<8x32xf32, #tpu.memory_space<vmem>>, vector<8x32xf32>,
    } else {
    }
    %c0_3 = arith.constant 0 : index
    %c0_4 = arith.constant 0 : index
    %c0_5 = arith.constant 0 : index
    %6 = vector.load %arg3[%c0_3, %c0_4, %c0_5] : memref<1x32x128xbf16, #tpu.memory_space<vmem>>, vector<1x32x128xbf16>
    %7 = vector.shape_cast %6 : vector<1x32x128xbf16> to vector<32x128xbf16>
    %c0_6 = arith.constant 0 : index
    %c0_7 = arith.constant 0 : index
    %c0_8 = arith.constant 0 : index
    %8 = vector.load %arg4[%c0_6, %c0_7, %c0_8] : memref<1x32x128xbf16, #tpu.memory_space<vmem>>, vector<1x32x128xbf16>
    %9 = vector.shape_cast %8 : vector<1x32x128xbf16> to vector<32x128xbf16>
    %c0_9 = arith.constant 0 : index
    %c0_10 = arith.constant 0 : index
    %c0_11 = arith.constant 0 : index
    %10 = vector.load %arg5[%c0_9, %c0_10, %c0_11] : memref<1x32x128xbf16, #tpu.memory_space<vmem>>, vector<1x32x128xbf16>
    %11 = vector.shape_cast %10 : vector<1x32x128xbf16> to vector<32x128xbf16>
    %c0_12 = arith.constant 0 : index
    %c0_13 = arith.constant 0 : index
    %c0_14 = arith.constant 0 : index
    %12 = vector.load %arg6[%c0_12, %c0_13, %c0_14] : memref<1x128x32xbf16, #tpu.memory_space<vmem>>, vector<1x128x32xbf16>
    %13 = vector.shape_cast %12 : vector<1x128x32xbf16> to vector<128x32xbf16>
    %cst = arith.constant dense<0.000000e+00> : vector<8x128xf32>
    %14 = tpu.matmul %2, %7, %cst {dimension_numbers = #tpu.dot_dimension_numbers<[1], [0], [0], [1], [0, 0, 1, 1], [], []>} : vector<8x32xbf16>, vector<32x128xbf16>, vector<8x128xf32> -> vector<8x128xf32>
    %cst_15 = arith.constant dense<0.000000e+00> : vector<8x128xf32>
    %15 = tpu.matmul %2, %9, %cst_15 {dimension_numbers = #tpu.dot_dimension_numbers<[1], [0], [0], [1], [0, 0, 1, 1], [], []>} : vector<8x32xbf16>, vector<32x128xbf16>, vector<8x128xf32> -> vector<8x128xf32>
    %cst_16 = arith.constant dense<0.000000e+00> : vector<8x128xf32>
    %16 = tpu.matmul %2, %11, %cst_16 {dimension_numbers = #tpu.dot_dimension_numbers<[1], [0], [0], [1], [0, 0, 1, 1], [], []>} : vector<8x32xbf16>, vector<32x128xbf16>, vector<8x128xf32> -> vector<8x128xf32>
    %cst_17 = arith.constant 0.000000e+00 : f32
    %17 = vector.broadcast %cst_17 : f32 to vector<8x32xf32>
    %18 = vector.extract_strided_slice %14 {offsets = [0, 0], sizes = [8, 32], strides = [1, 1]} : vector<8x128xf32> to vector<8x32xf32>
    %19 = arith.truncf %18 : vector<8x32xf32> to vector<8x32xbf16>
    %20 = vector.extract_strided_slice %15 {offsets = [0, 0], sizes = [8, 32], strides = [1, 1]} : vector<8x128xf32> to vector<8x32xf32>
    %21 = arith.truncf %20 : vector<8x32xf32> to vector<8x32xbf16>
    %22 = vector.extract_strided_slice %16 {offsets = [0, 0], sizes = [8, 32], strides = [1, 1]} : vector<8x128xf32> to vector<8x32xf32>
    %23 = arith.truncf %22 : vector<8x32xf32> to vector<8x32xbf16>
    %cst_18 = arith.constant dense<0.000000e+00> : vector<8x8xf32>
    %24 = tpu.matmul %19, %21, %cst_18 {dimension_numbers = #tpu.dot_dimension_numbers<[1], [1], [0], [0], [0, 0, 1, 0], [], []>} : vector<8x32xbf16>, vector<8x32xbf16>, vector<8x8xf32> -> vector<8x8xf32>
    %cst_19 = arith.constant dense<0xFF800000> : vector<8xf32>
    %25 = vector.multi_reduction <maximumf>, %24, %cst_19 [1] : vector<8x8xf32> to vector<8xf32>
    %26 = vector.shape_cast %25 : vector<8xf32> to vector<8x1xf32>
    %27 = vector.broadcast %26 : vector<8x1xf32> to vector<8x8xf32>
    %28 = arith.subf %24, %27 : vector<8x8xf32>
    %29 = math.exp %28 : vector<8x8xf32>
    %cst_20 = arith.constant dense<0.000000e+00> : vector<8xf32>
    %30 = vector.multi_reduction <add>, %29, %cst_20 [1] : vector<8x8xf32> to vector<8xf32>
    %31 = vector.shape_cast %30 : vector<8xf32> to vector<8x1xf32>
    %32 = arith.truncf %29 : vector<8x8xf32> to vector<8x8xbf16>
    %cst_21 = arith.constant dense<0.000000e+00> : vector<8x32xf32>
    %33 = tpu.matmul %32, %23, %cst_21 {dimension_numbers = #tpu.dot_dimension_numbers<[1], [0], [0], [1], [0, 0, 1, 1], [], []>} : vector<8x8xbf16>, vector<8x32xbf16>, vector<8x32xf32> -> vector<8x32xf32>
    %34 = tpu.reciprocal %31 {approx = true} : vector<8x1xf32> -> vector<8x1xf32>
    %35 = vector.broadcast %34 : vector<8x1xf32> to vector<8x32xf32>
    %36 = arith.mulf %33, %35 : vector<8x32xf32>
    %37 = arith.truncf %36 : vector<8x32xf32> to vector<8x32xbf16>
    %38 = vector.extract_strided_slice %13 {offsets = [0, 0], sizes = [32, 32], strides = [1, 1]} : vector<128x32xbf16> to vector<32x32xbf16>
    %cst_22 = arith.constant dense<0.000000e+00> : vector<8x32xf32>
    %39 = tpu.matmul %37, %38, %cst_22 {dimension_numbers = #tpu.dot_dimension_numbers<[1], [0], [0], [1], [0, 0, 1, 1], [], []>} : vector<8x32xbf16>, vector<32x32xbf16>, vector<8x32xf32> -> vector<8x32xf32>
    %40 = arith.addf %17, %39 : vector<8x32xf32>
    %41 = vector.extract_strided_slice %14 {offsets = [0, 32], sizes = [8, 32], strides = [1, 1]} : vector<8x128xf32> to vector<8x32xf32>
    %42 = arith.truncf %41 : vector<8x32xf32> to vector<8x32xbf16>
    %43 = vector.extract_strided_slice %15 {offsets = [0, 32], sizes = [8, 32], strides = [1, 1]} : vector<8x128xf32> to vector<8x32xf32>
    %44 = arith.truncf %43 : vector<8x32xf32> to vector<8x32xbf16>
    %45 = vector.extract_strided_slice %16 {offsets = [0, 32], sizes = [8, 32], strides = [1, 1]} : vector<8x128xf32> to vector<8x32xf32>
    %46 = arith.truncf %45 : vector<8x32xf32> to vector<8x32xbf16>
    %cst_23 = arith.constant dense<0.000000e+00> : vector<8x8xf32>
    %47 = tpu.matmul %42, %44, %cst_23 {dimension_numbers = #tpu.dot_dimension_numbers<[1], [1], [0], [0], [0, 0, 1, 0], [], []>} : vector<8x32xbf16>, vector<8x32xbf16>, vector<8x8xf32> -> vector<8x8xf32>
    %cst_24 = arith.constant dense<0xFF800000> : vector<8xf32>
    %48 = vector.multi_reduction <maximumf>, %47, %cst_24 [1] : vector<8x8xf32> to vector<8xf32>
    %49 = vector.shape_cast %48 : vector<8xf32> to vector<8x1xf32>
    %50 = vector.broadcast %49 : vector<8x1xf32> to vector<8x8xf32>
    %51 = arith.subf %47, %50 : vector<8x8xf32>
    %52 = math.exp %51 : vector<8x8xf32>
    %cst_25 = arith.constant dense<0.000000e+00> : vector<8xf32>
    %53 = vector.multi_reduction <add>, %52, %cst_25 [1] : vector<8x8xf32> to vector<8xf32>
    %54 = vector.shape_cast %53 : vector<8xf32> to vector<8x1xf32>
    %55 = arith.truncf %52 : vector<8x8xf32> to vector<8x8xbf16>
    %cst_26 = arith.constant dense<0.000000e+00> : vector<8x32xf32>
    %56 = tpu.matmul %55, %46, %cst_26 {dimension_numbers = #tpu.dot_dimension_numbers<[1], [0], [0], [1], [0, 0, 1, 1], [], []>} : vector<8x8xbf16>, vector<8x32xbf16>, vector<8x32xf32> -> vector<8x32xf32>
    %57 = tpu.reciprocal %54 {approx = true} : vector<8x1xf32> -> vector<8x1xf32>
    %58 = vector.broadcast %57 : vector<8x1xf32> to vector<8x32xf32>
    %59 = arith.mulf %56, %58 : vector<8x32xf32>
    %60 = arith.truncf %59 : vector<8x32xf32> to vector<8x32xbf16>
    %61 = vector.extract_strided_slice %13 {offsets = [32, 0], sizes = [32, 32], strides = [1, 1]} : vector<128x32xbf16> to vector<32x32xbf16>
    %cst_27 = arith.constant dense<0.000000e+00> : vector<8x32xf32>
    %62 = tpu.matmul %60, %61, %cst_27 {dimension_numbers = #tpu.dot_dimension_numbers<[1], [0], [0], [1], [0, 0, 1, 1], [], []>} : vector<8x32xbf16>, vector<32x32xbf16>, vector<8x32xf32> -> vector<8x32xf32>
    %63 = arith.addf %40, %62 : vector<8x32xf32>
    %64 = vector.extract_strided_slice %14 {offsets = [0, 64], sizes = [8, 32], strides = [1, 1]} : vector<8x128xf32> to vector<8x32xf32>
    %65 = arith.truncf %64 : vector<8x32xf32> to vector<8x32xbf16>
    %66 = vector.extract_strided_slice %15 {offsets = [0, 64], sizes = [8, 32], strides = [1, 1]} : vector<8x128xf32> to vector<8x32xf32>
    %67 = arith.truncf %66 : vector<8x32xf32> to vector<8x32xbf16>
    %68 = vector.extract_strided_slice %16 {offsets = [0, 64], sizes = [8, 32], strides = [1, 1]} : vector<8x128xf32> to vector<8x32xf32>
    %69 = arith.truncf %68 : vector<8x32xf32> to vector<8x32xbf16>
    %cst_28 = arith.constant dense<0.000000e+00> : vector<8x8xf32>
    %70 = tpu.matmul %65, %67, %cst_28 {dimension_numbers = #tpu.dot_dimension_numbers<[1], [1], [0], [0], [0, 0, 1, 0], [], []>} : vector<8x32xbf16>, vector<8x32xbf16>, vector<8x8xf32> -> vector<8x8xf32>
    %cst_29 = arith.constant dense<0xFF800000> : vector<8xf32>
    %71 = vector.multi_reduction <maximumf>, %70, %cst_29 [1] : vector<8x8xf32> to vector<8xf32>
    %72 = vector.shape_cast %71 : vector<8xf32> to vector<8x1xf32>
    %73 = vector.broadcast %72 : vector<8x1xf32> to vector<8x8xf32>
    %74 = arith.subf %70, %73 : vector<8x8xf32>
    %75 = math.exp %74 : vector<8x8xf32>
    %cst_30 = arith.constant dense<0.000000e+00> : vector<8xf32>
    %76 = vector.multi_reduction <add>, %75, %cst_30 [1] : vector<8x8xf32> to vector<8xf32>
    %77 = vector.shape_cast %76 : vector<8xf32> to vector<8x1xf32>
    %78 = arith.truncf %75 : vector<8x8xf32> to vector<8x8xbf16>
    %cst_31 = arith.constant dense<0.000000e+00> : vector<8x32xf32>
    %79 = tpu.matmul %78, %69, %cst_31 {dimension_numbers = #tpu.dot_dimension_numbers<[1], [0], [0], [1], [0, 0, 1, 1], [], []>} : vector<8x8xbf16>, vector<8x32xbf16>, vector<8x32xf32> -> vector<8x32xf32>
    %80 = tpu.reciprocal %77 {approx = true} : vector<8x1xf32> -> vector<8x1xf32>
    %81 = vector.broadcast %80 : vector<8x1xf32> to vector<8x32xf32>
    %82 = arith.mulf %79, %81 : vector<8x32xf32>
    %83 = arith.truncf %82 : vector<8x32xf32> to vector<8x32xbf16>
    %84 = vector.extract_strided_slice %13 {offsets = [64, 0], sizes = [32, 32], strides = [1, 1]} : vector<128x32xbf16> to vector<32x32xbf16>
    %cst_32 = arith.constant dense<0.000000e+00> : vector<8x32xf32>
    %85 = tpu.matmul %83, %84, %cst_32 {dimension_numbers = #tpu.dot_dimension_numbers<[1], [0], [0], [1], [0, 0, 1, 1], [], []>} : vector<8x32xbf16>, vector<32x32xbf16>, vector<8x32xf32> -> vector<8x32xf32>
    %86 = arith.addf %63, %85 : vector<8x32xf32>
    %87 = vector.extract_strided_slice %14 {offsets = [0, 96], sizes = [8, 32], strides = [1, 1]} : vector<8x128xf32> to vector<8x32xf32>
    %88 = arith.truncf %87 : vector<8x32xf32> to vector<8x32xbf16>
    %89 = vector.extract_strided_slice %15 {offsets = [0, 96], sizes = [8, 32], strides = [1, 1]} : vector<8x128xf32> to vector<8x32xf32>
    %90 = arith.truncf %89 : vector<8x32xf32> to vector<8x32xbf16>
    %91 = vector.extract_strided_slice %16 {offsets = [0, 96], sizes = [8, 32], strides = [1, 1]} : vector<8x128xf32> to vector<8x32xf32>
    %92 = arith.truncf %91 : vector<8x32xf32> to vector<8x32xbf16>
    %cst_33 = arith.constant dense<0.000000e+00> : vector<8x8xf32>
    %93 = tpu.matmul %88, %90, %cst_33 {dimension_numbers = #tpu.dot_dimension_numbers<[1], [1], [0], [0], [0, 0, 1, 0], [], []>} : vector<8x32xbf16>, vector<8x32xbf16>, vector<8x8xf32> -> vector<8x8xf32>
    %cst_34 = arith.constant dense<0xFF800000> : vector<8xf32>
    %94 = vector.multi_reduction <maximumf>, %93, %cst_34 [1] : vector<8x8xf32> to vector<8xf32>
    %95 = vector.shape_cast %94 : vector<8xf32> to vector<8x1xf32>
    %96 = vector.broadcast %95 : vector<8x1xf32> to vector<8x8xf32>
    %97 = arith.subf %93, %96 : vector<8x8xf32>
    %98 = math.exp %97 : vector<8x8xf32>
    %cst_35 = arith.constant dense<0.000000e+00> : vector<8xf32>
    %99 = vector.multi_reduction <add>, %98, %cst_35 [1] : vector<8x8xf32> to vector<8xf32>
    %100 = vector.shape_cast %99 : vector<8xf32> to vector<8x1xf32>
    %101 = arith.truncf %98 : vector<8x8xf32> to vector<8x8xbf16>
    %cst_36 = arith.constant dense<0.000000e+00> : vector<8x32xf32>
    %102 = tpu.matmul %101, %92, %cst_36 {dimension_numbers = #tpu.dot_dimension_numbers<[1], [0], [0], [1], [0, 0, 1, 1], [], []>} : vector<8x8xbf16>, vector<8x32xbf16>, vector<8x32xf32> -> vector<8x32xf32>
    %103 = tpu.reciprocal %100 {approx = true} : vector<8x1xf32> -> vector<8x1xf32>
    %104 = vector.broadcast %103 : vector<8x1xf32> to vector<8x32xf32>
    %105 = arith.mulf %102, %104 : vector<8x32xf32>
    %106 = arith.truncf %105 : vector<8x32xf32> to vector<8x32xbf16>
    %107 = vector.extract_strided_slice %13 {offsets = [96, 0], sizes = [32, 32], strides = [1, 1]} : vector<128x32xbf16> to vector<32x32xbf16>
    %cst_37 = arith.constant dense<0.000000e+00> : vector<8x32xf32>
    %108 = tpu.matmul %106, %107, %cst_37 {dimension_numbers = #tpu.dot_dimension_numbers<[1], [0], [0], [1], [0, 0, 1, 1], [], []>} : vector<8x32xbf16>, vector<32x32xbf16>, vector<8x32xf32> -> vector<8x32xf32>
    %109 = arith.addf %86, %108 : vector<8x32xf32>
    %c0_38 = arith.constant 0 : index
    %c0_39 = arith.constant 0 : index
    %110 = vector.load %arg17[%c0_38, %c0_39] : memref<8x32xf32, #tpu.memory_space<vmem>>, vector<8x32xf32>
    %111 = arith.addf %110, %109 : vector<8x32xf32>
    %c0_40 = arith.constant 0 : index
    %c0_41 = arith.constant 0 : index
    %112 = vector.load %arg17[%c0_40, %c0_41] : memref<8x32xf32, #tpu.memory_space<vmem>>, vector<8x32xf32>
    tpu.vector_store %arg17[%c0_40, %c0_41], %111 {strides = array<i32>} : memref<8x32xf32, #tpu.memory_space<vmem>>, vector<8x32xf32>,
    %c0_i32_42 = arith.constant 0 : i32
    %113 = arith.cmpi eq, %arg1, %c0_i32_42 : i32
    %114 = arith.extui %113 : i1 to i32
    %c0_i32_43 = arith.constant 0 : i32
    %115 = arith.cmpi ne, %114, %c0_i32_43 : i32
    scf.if %115 {
      %c0_44 = arith.constant 0 : index
      %c0_45 = arith.constant 0 : index
      %116 = vector.load %arg17[%c0_44, %c0_45] : memref<8x32xf32, #tpu.memory_space<vmem>>, vector<8x32xf32>
      %c0_46 = arith.constant 0 : index
      %c0_47 = arith.constant 0 : index
      %117 = vector.load %arg7[%c0_46, %c0_47] : memref<1x32xf32, #tpu.memory_space<vmem>>, vector<1x32xf32>
      %118 = vector.broadcast %117 : vector<1x32xf32> to vector<8x32xf32>
      %119 = arith.addf %116, %118 : vector<8x32xf32>
      %120 = arith.addf %1, %119 : vector<8x32xf32>
      %c0_48 = arith.constant 0 : index
      %c0_49 = arith.constant 0 : index
      %121 = vector.load %arg8[%c0_48, %c0_49] : memref<1x32xf32, #tpu.memory_space<vmem>>, vector<1x32xf32>
      %c0_50 = arith.constant 0 : index
      %c0_51 = arith.constant 0 : index
      %122 = vector.load %arg9[%c0_50, %c0_51] : memref<1x32xf32, #tpu.memory_space<vmem>>, vector<1x32xf32>
      %cst_52 = arith.constant dense<0.000000e+00> : vector<8xf32>
      %123 = vector.multi_reduction <add>, %120, %cst_52 [1] : vector<8x32xf32> to vector<8xf32>
      %124 = vector.shape_cast %123 : vector<8xf32> to vector<8x1xf32>
      %cst_53 = arith.constant 3.200000e+01 : f32
      %125 = vector.broadcast %cst_53 : f32 to vector<8x1xf32>
      %126 = arith.divf %124, %125 : vector<8x1xf32>
      %127 = vector.broadcast %126 : vector<8x1xf32> to vector<8x32xf32>
      %128 = arith.subf %120, %127 : vector<8x32xf32>
      %129 = arith.mulf %128, %128 : vector<8x32xf32>
      %cst_54 = arith.constant dense<0.000000e+00> : vector<8xf32>
      %130 = vector.multi_reduction <add>, %129, %cst_54 [1] : vector<8x32xf32> to vector<8xf32>
      %131 = vector.shape_cast %130 : vector<8xf32> to vector<8x1xf32>
      %cst_55 = arith.constant 3.200000e+01 : f32
      %132 = vector.broadcast %cst_55 : f32 to vector<8x1xf32>
      %133 = arith.divf %131, %132 : vector<8x1xf32>
      %134 = vector.broadcast %126 : vector<8x1xf32> to vector<8x32xf32>
      %135 = arith.subf %120, %134 : vector<8x32xf32>
      %cst_56 = arith.constant 9.99999974E-6 : f32
      %136 = vector.broadcast %cst_56 : f32 to vector<8x1xf32>
      %137 = arith.addf %133, %136 : vector<8x1xf32>
      %138 = math.rsqrt %137 : vector<8x1xf32>
      %139 = vector.broadcast %138 : vector<8x1xf32> to vector<8x32xf32>
      %140 = arith.mulf %135, %139 : vector<8x32xf32>
      %141 = vector.broadcast %121 : vector<1x32xf32> to vector<8x32xf32>
      %142 = arith.mulf %140, %141 : vector<8x32xf32>
      %143 = vector.broadcast %122 : vector<1x32xf32> to vector<8x32xf32>
      %144 = arith.addf %142, %143 : vector<8x32xf32>
      %145 = arith.truncf %144 : vector<8x32xf32> to vector<8x32xbf16>
      %cst_57 = arith.constant 0.000000e+00 : f32
      %146 = vector.broadcast %cst_57 : f32 to vector<8x32xf32>
      %c0_58 = arith.constant 0 : index
      %c0_59 = arith.constant 0 : index
      %147 = vector.load %arg10[%c0_58, %c0_59] : memref<32x128xbf16, #tpu.memory_space<vmem>>, vector<32x128xbf16>
      %cst_60 = arith.constant dense<0.000000e+00> : vector<8x128xf32>
      %148 = tpu.matmul %145, %147, %cst_60 {dimension_numbers = #tpu.dot_dimension_numbers<[1], [0], [0], [1], [0, 0, 1, 1], [], []>} : vector<8x32xbf16>, vector<32x128xbf16>, vector<8x128xf32> -> vector<8x128xf32>
      %c0_61 = arith.constant 0 : index
      %c0_62 = arith.constant 0 : index
      %149 = vector.load %arg11[%c0_61, %c0_62] : memref<1x128xf32, #tpu.memory_space<vmem>>, vector<1x128xf32>
      %150 = vector.broadcast %149 : vector<1x128xf32> to vector<8x128xf32>
      %151 = arith.addf %148, %150 : vector<8x128xf32>
      %cst_63 = arith.constant 0.000000e+00 : f32
      %152 = vector.broadcast %cst_63 : f32 to vector<8x128xf32>
      %153 = arith.maximumf %151, %152 : vector<8x128xf32>
      %154 = arith.truncf %153 : vector<8x128xf32> to vector<8x128xbf16>
      %c0_64 = arith.constant 0 : index
      %c0_65 = arith.constant 0 : index
      %155 = vector.load %arg12[%c0_64, %c0_65] : memref<128x32xbf16, #tpu.memory_space<vmem>>, vector<128x32xbf16>
      %cst_66 = arith.constant dense<0.000000e+00> : vector<8x32xf32>
      %156 = tpu.matmul %154, %155, %cst_66 {dimension_numbers = #tpu.dot_dimension_numbers<[1], [0], [0], [1], [0, 0, 1, 1], [], []>} : vector<8x128xbf16>, vector<128x32xbf16>, vector<8x32xf32> -> vector<8x32xf32>
      %157 = arith.addf %146, %156 : vector<8x32xf32>
      %c0_67 = arith.constant 0 : index
      %c0_68 = arith.constant 0 : index
      %158 = vector.load %arg13[%c0_67, %c0_68] : memref<1x32xf32, #tpu.memory_space<vmem>>, vector<1x32xf32>
      %159 = vector.broadcast %158 : vector<1x32xf32> to vector<8x32xf32>
      %160 = arith.addf %157, %159 : vector<8x32xf32>
      %161 = arith.addf %144, %160 : vector<8x32xf32>
      %c0_69 = arith.constant 0 : index
      %c0_70 = arith.constant 0 : index
      %162 = vector.load %arg14[%c0_69, %c0_70] : memref<1x32xf32, #tpu.memory_space<vmem>>, vector<1x32xf32>
      %c0_71 = arith.constant 0 : index
      %c0_72 = arith.constant 0 : index
      %163 = vector.load %arg15[%c0_71, %c0_72] : memref<1x32xf32, #tpu.memory_space<vmem>>, vector<1x32xf32>
      %cst_73 = arith.constant dense<0.000000e+00> : vector<8xf32>
      %164 = vector.multi_reduction <add>, %161, %cst_73 [1] : vector<8x32xf32> to vector<8xf32>
      %165 = vector.shape_cast %164 : vector<8xf32> to vector<8x1xf32>
      %cst_74 = arith.constant 3.200000e+01 : f32
      %166 = vector.broadcast %cst_74 : f32 to vector<8x1xf32>
      %167 = arith.divf %165, %166 : vector<8x1xf32>
      %168 = vector.broadcast %167 : vector<8x1xf32> to vector<8x32xf32>
      %169 = arith.subf %161, %168 : vector<8x32xf32>
      %170 = arith.mulf %169, %169 : vector<8x32xf32>
      %cst_75 = arith.constant dense<0.000000e+00> : vector<8xf32>
      %171 = vector.multi_reduction <add>, %170, %cst_75 [1] : vector<8x32xf32> to vector<8xf32>
      %172 = vector.shape_cast %171 : vector<8xf32> to vector<8x1xf32>
      %cst_76 = arith.constant 3.200000e+01 : f32
      %173 = vector.broadcast %cst_76 : f32 to vector<8x1xf32>
      %174 = arith.divf %172, %173 : vector<8x1xf32>
      %175 = vector.broadcast %167 : vector<8x1xf32> to vector<8x32xf32>
      %176 = arith.subf %161, %175 : vector<8x32xf32>
      %cst_77 = arith.constant 9.99999974E-6 : f32
      %177 = vector.broadcast %cst_77 : f32 to vector<8x1xf32>
      %178 = arith.addf %174, %177 : vector<8x1xf32>
      %179 = math.rsqrt %178 : vector<8x1xf32>
      %180 = vector.broadcast %179 : vector<8x1xf32> to vector<8x32xf32>
      %181 = arith.mulf %176, %180 : vector<8x32xf32>
      %182 = vector.broadcast %162 : vector<1x32xf32> to vector<8x32xf32>
      %183 = arith.mulf %181, %182 : vector<8x32xf32>
      %184 = vector.broadcast %163 : vector<1x32xf32> to vector<8x32xf32>
      %185 = arith.addf %183, %184 : vector<8x32xf32>
      %c0_78 = arith.constant 0 : index
      %c0_79 = arith.constant 0 : index
      %c0_80 = arith.constant 0 : index
      %186 = vector.load %arg16[%c0_78, %c0_79, %c0_80] : memref<1x8x32xf32, #tpu.memory_space<vmem>>, vector<1x8x32xf32>
      %187 = vector.shape_cast %186 : vector<1x8x32xf32> to vector<8x32xf32>
      %188 = vector.shape_cast %185 : vector<8x32xf32> to vector<1x8x32xf32>
      tpu.vector_store %arg16[%c0_78, %c0_79, %c0_80], %188 {strides = array<i32>} : memref<1x8x32xf32, #tpu.memory_space<vmem>>, vector<1x8x32xf32>,
    } else {
    }
    return
  }
  func.func @transform_0(%arg0: i32, %arg1: i32) -> (i32, i32, i32) {
    %c0_i32 = arith.constant 0 : i32
    %c0_i32_0 = arith.constant 0 : i32
    %c0_i32_1 = arith.constant 0 : i32
    return %arg0, %c0_i32, %c0_i32_0 : i32, i32, i32
  }
  func.func @transform_1(%arg0: i32, %arg1: i32) -> (i32, i32, i32) {
    %c0_i32 = arith.constant 0 : i32
    %c0_i32_0 = arith.constant 0 : i32
    %c0_i32_1 = arith.constant 0 : i32
    return %arg1, %c0_i32, %c0_i32_0 : i32, i32, i32
  }
  func.func @transform_2(%arg0: i32, %arg1: i32) -> (i32, i32, i32) {
    %c0_i32 = arith.constant 0 : i32
    %c0_i32_0 = arith.constant 0 : i32
    %c0_i32_1 = arith.constant 0 : i32
    return %arg1, %c0_i32, %c0_i32_0 : i32, i32, i32
  }
  func.func @transform_3(%arg0: i32, %arg1: i32) -> (i32, i32, i32) {
    %c0_i32 = arith.constant 0 : i32
    %c0_i32_0 = arith.constant 0 : i32
    %c0_i32_1 = arith.constant 0 : i32
    return %arg1, %c0_i32, %c0_i32_0 : i32, i32, i32
  }
  func.func @transform_4(%arg0: i32, %arg1: i32) -> (i32, i32, i32) {
    %c0_i32 = arith.constant 0 : i32
    %c0_i32_0 = arith.constant 0 : i32
    %c0_i32_1 = arith.constant 0 : i32
    return %arg1, %c0_i32, %c0_i32_0 : i32, i32, i32
  }
  func.func @transform_5(%arg0: i32, %arg1: i32) -> (i32, i32) {
    %c0_i32 = arith.constant 0 : i32
    %c0_i32_0 = arith.constant 0 : i32
    %c0_i32_1 = arith.constant 0 : i32
    return %c0_i32, %c0_i32_0 : i32, i32
  }
  func.func @transform_6(%arg0: i32, %arg1: i32) -> (i32, i32) {
    %c0_i32 = arith.constant 0 : i32
    %c0_i32_0 = arith.constant 0 : i32
    %c0_i32_1 = arith.constant 0 : i32
    return %c0_i32, %c0_i32_0 : i32, i32
  }
  func.func @transform_7(%arg0: i32, %arg1: i32) -> (i32, i32) {
    %c0_i32 = arith.constant 0 : i32
    %c0_i32_0 = arith.constant 0 : i32
    %c0_i32_1 = arith.constant 0 : i32
    return %c0_i32, %c0_i32_0 : i32, i32
  }
  func.func @transform_8(%arg0: i32, %arg1: i32) -> (i32, i32) {
    %c0_i32 = arith.constant 0 : i32
    %c0_i32_0 = arith.constant 0 : i32
    %c0_i32_1 = arith.constant 0 : i32
    return %c0_i32, %c0_i32_0 : i32, i32
  }
  func.func @transform_9(%arg0: i32, %arg1: i32) -> (i32, i32) {
    %c0_i32 = arith.constant 0 : i32
    %c0_i32_0 = arith.constant 0 : i32
    %c0_i32_1 = arith.constant 0 : i32
    return %c0_i32, %c0_i32_0 : i32, i32
  }
  func.func @transform_10(%arg0: i32, %arg1: i32) -> (i32, i32) {
    %c0_i32 = arith.constant 0 : i32
    %c0_i32_0 = arith.constant 0 : i32
    %c0_i32_1 = arith.constant 0 : i32
    return %c0_i32, %c0_i32_0 : i32, i32
  }
  func.func @transform_11(%arg0: i32, %arg1: i32) -> (i32, i32) {
    %c0_i32 = arith.constant 0 : i32
    %c0_i32_0 = arith.constant 0 : i32
    %c0_i32_1 = arith.constant 0 : i32
    return %c0_i32, %c0_i32_0 : i32, i32
  }
  func.func @transform_12(%arg0: i32, %arg1: i32) -> (i32, i32) {
    %c0_i32 = arith.constant 0 : i32
    %c0_i32_0 = arith.constant 0 : i32
    %c0_i32_1 = arith.constant 0 : i32
    return %c0_i32, %c0_i32_0 : i32, i32
  }
  func.func @transform_13(%arg0: i32, %arg1: i32) -> (i32, i32) {
    %c0_i32 = arith.constant 0 : i32
    %c0_i32_0 = arith.constant 0 : i32
    %c0_i32_1 = arith.constant 0 : i32
    return %c0_i32, %c0_i32_0 : i32, i32
  }
  func.func @transform_14(%arg0: i32, %arg1: i32) -> (i32, i32, i32) {
    %c0_i32 = arith.constant 0 : i32
    %c0_i32_0 = arith.constant 0 : i32
    %c0_i32_1 = arith.constant 0 : i32
    return %arg0, %c0_i32, %c0_i32_0 : i32, i32, i32
  }
}

</mosaic_0001>

<bundles_post_ra>
// kernel: tpu_custom_call.1
= control target key start
LH: loop header
LB: loop body
LE: loop exit
PB: predicated region body
PF: predicated region fallthrough
CT: control target
= control target key end

     0   :  { %s2669_s0 = inlined_call_operand.vmem [shape: f32[2,8,32], index: 0, kind: input, shape index: {}]   ;;  %s2670_s1 = inlined_call_operand.vmem [shape: bf16[1,32,128], index: 1, kind: input, shape index: {}]   ;;  %s2671_s2 = inlined_call_operand.vmem [shape: bf16[1,32,128], index: 2, kind: input, shape index: {}]   ;;  %s2672_s3 = inlined_call_operand.vmem [shape: bf16[1,32,128], index: 3, kind: input, shape index: {}]   ;;  %s2673_s4 = inlined_call_operand.vmem [shape: bf16[1,128,32], index: 4, kind: input, shape index: {}]   ;;  %s2674_s5 = inlined_call_operand.vmem [shape: f32[1,32], index: 5, kind: input, shape index: {}]   ;;  %s2675_s6 = inlined_call_operand.vmem [shape: f32[1,32], index: 6, kind: input, shape index: {}]   ;;  %s2676_s7 = inlined_call_operand.vmem [shape: f32[1,32], index: 7, kind: input, shape index: {}]   ;;  %s2677_s8 = inlined_call_operand.vmem [shape: bf16[32,128], index: 8, kind: input, shape index: {}]   ;;  %s2678_s9 = inlined_call_operand.vmem [shape: f32[1,128], index: 9, kind: input, shape index: {}]   ;;  %s2679_s10 = inlined_call_operand.vmem [shape: bf16[128,32], index: 10, kind: input, shape index: {}]   ;;  %s2680_s11 = inlined_call_operand.vmem [shape: f32[1,32], index: 11, kind: input, shape index: {}]   ;;  %s2681_s12 = inlined_call_operand.vmem [shape: f32[1,32], index: 12, kind: input, shape index: {}]   ;;  %s2682_s13 = inlined_call_operand.vmem [shape: f32[1,32], index: 13, kind: input, shape index: {}]   ;;  %s2683_s14 = inlined_call_operand.hbm [shape: f32[2,8,32], index: 14, kind: output, shape index: {}]  }
   0x1   :  { %2686 = sst [smem:[#allocation8_spill]] %s2669_s0 }
   0x2   :  { %2687 = sst [smem:[#allocation9_spill]] %s2670_s1 }
   0x3   :  { %2688 = sst [smem:[#allocation10_spill]] %s2671_s2 }
   0x4   :  { %2689 = sst [smem:[#allocation11_spill]] %s2672_s3 }
   0x5   :  { %19 = vsyncpa [#allocation4], 0 }
   0x6   :  { %21 = vsyncpa [#allocation4 + $0x1], 0  ;;  %s2326_s29 = smov 0   ;;  %s2328_s30 = smov 0  }
   0x7   :  { %s2330_s15 = smov 0   ;;  %s2332_s16 = smov 0  }
   0x8   :  { %s2334_s17 = smov 0   ;;  %s2336_s18 = smov 0  }
   0x9 LB: > { %2690 = sst [smem:[#allocation6_spill]] %s2239_s17  ;;  %s1818_s19 = sadd.s32 4294967295, %s2243_s18   ;;  %s2243_s18 = sphi %s2336_s18, %s27_s18   ;;  %s2239_s17 = sphi %s2334_s17, %s2699_s17   ;;  %s2235_s16 = sphi %s2332_s16, %s2698_s16   ;;  %s2231_s15 = sphi %s2330_s15, %s2702_s15   ;;  %s2227_s30 = sphi %s2328_s30, %s2701_s30   ;;  %s2223_s29 = sphi %s2326_s29, %s2700_s29  }
   0xa   : > { %s1819_s20 = sadd.s32 4294967294, %s2243_s18   ;;  %s39_s21 = sadd.s32 1, %s2239_s17 }
   0xb   : > { %s365_s22 = sadd.s32 1, %s2231_s15  ;;  %p41_p0 = scmp.ge.s32.totalorder %s39_s21, 2 }
   0xc   : > { %p375_p1 = scmp.ne.s32.totalorder %s2231_s15, %s2227_s30  ;;  %p376_p2 = scmp.eq.s32.totalorder %s1818_s19, 1 }
   0xd   : > { %p381_p3 = scmp.ne.s32.totalorder %s2227_s30, %s2223_s29  ;;  %s2704_s21 = smov (%p41_p0, %s39_s21), 0 }
   0xe   : > { %2691 = sst [smem:[#allocation7_spill]] %s2704_s21  ;;  %p2366_p4 = por %p376_p2, %p375_p1 }
   0xf   : > { %p382_p5 = scmp.eq.s32.totalorder %s1819_s20, 1  ;;  %s362_s24 = ssub.s32 %s2239_s17, %s2704_s21 }
  0x10   : > { %p1826_p6 = scmp.ge.s32.totalorder %s2243_s18, 1  ;;  %p363_p7 = scmp.eq.s32.totalorder %s362_s24, 0 }
  0x11   : > { %p2373_p8 = por %p382_p5, %p381_p3  ;;  %p466_p9 = scmp.lt.s32.totalorder %s2243_s18, 3 }
  0x12   : > { %s2379_s26 = scalar_select %p363_p7, %s2231_s15, %s365_s22  }
  0x13   : > { %p467_p10 = pnand %p1826_p6, %p466_p9 }
  0x14   : > { %s2694_s1 = sld [smem:[#allocation9_spill]] (!%p467_p10)  ;;  %v2245_v1 = vmov (!%p467_p10), 0.0   ;;  %vm2246_vm0 = vmmov (!%p467_p10), 0   ;;  %p531_p11 = scmp.lt.s32.totalorder (!%p467_p10), %s2235_s16, 1  ;;  %vm562_vm1 = vcmask (!%p467_p10), 261120   ;;  %vm815_vm2 = vcmask (!%p467_p10), 1043456  }
  0x15   : > { %470 = sbr.rel (%p467_p10) target bundleno = 3248 (0xcb0), region = 76  ;;  %1929 = vmatprep.subr.bf16.mxu1 (!%p467_p10), %v2245_v1  ;;  %1959 = vmatprep.subr.bf16.mxu0 (!%p467_p10), %v2245_v1  ;;  %563 = vst.msk [vmem:[#allocation2] sm:$0xff] (!%p467_p10), %vm562_vm1, %v2245_v1  ;;  %s2695_s2 = sld [smem:[#allocation10_spill]] (!%p467_p10)  ;;  %vm801_vm3 = vcmask (!%p467_p10), 64512   ;;  %v2127_v51 = vld [vmem:[%s2673_s4] sm:$0xff] (!%p467_p10)   ;;  %v2128_v54 = vld [vmem:[%s2673_s4 + $0x8] sm:$0xff] (!%p467_p10)  }
  0x16   : > { %1933 = vmatprep.mubr.msk.bf16.mxu1 (!%p467_p10), %vm2246_vm0, %v2245_v1  ;;  %1961 = vmatprep.mubr.msk.bf16.mxu0 (!%p467_p10), %vm2246_vm0, %v2245_v1  ;;  %s2696_s0 = sld [smem:[#allocation8_spill]] (!%p467_p10)  ;;  %s2697_s3 = sld [smem:[#allocation11_spill]] (!%p467_p10)  ;;  %v2129_v55 = vld [vmem:[%s2673_s4 + $0x10] sm:$0xff] (!%p467_p10)   ;;  %v2130_v56 = vld [vmem:[%s2673_s4 + $0x18] sm:$0xff] (!%p467_p10)  }
  0x17   : > { %s2247_s21 = smov (!%p467_p10), 96   ;;  %s2248_s27 = smov (!%p467_p10), 64  }
  0x18   : > { %s2249_s28 = smov (!%p467_p10), 32   ;;  %s1877_s19 = sshll.u32 (!%p467_p10), %s2235_s16, 7 }
  0x1a   : > { %v2121_v0 = vld [vmem:[%s2694_s1] sm:$0xff] (!%p467_p10)   ;;  %v2122_v2 = vld [vmem:[%s2694_s1 + $0x8] sm:$0xff] (!%p467_p10)  }
  0x1b   : > { %1930 = vmatpush3.bf16.msra.mxu1 (!%p467_p10), %v2121_v0  ;;  %v2123_v3 = vld [vmem:[%s2695_s2] sm:$0xff] (!%p467_p10)   ;;  %v2124_v6 = vld [vmem:[%s2695_s2 + $0x8] sm:$0xff] (!%p467_p10)  }
  0x1c   : > { %1931 = vmatprep.subr.bf16.mxu1 %v2245_v1  ;;  %s532_s22 = scalar_select %p531_p11, %s2235_s16, 1  ;;  %v2125_v7 = vld [vmem:[%s2697_s3] sm:$0xff]   ;;  %v2126_v8 = vld [vmem:[%s2697_s3 + $0x8] sm:$0xff]  }
  0x1d   : > { %s2621_s3 = scalar_lea.hbm %s2683_s14, %s1877_s19  ;;  %s2250_s16 = smov [#allocation3]  }
  0x1e   : > { %s1828_s24 = sshll.u32 %s532_s22, 3  ;;  %s528_s22 = sand.u32 1, %s2227_s30  }
  0x1f   : > { %1932 = vmatpush3.bf16.msra.mxu1 %v2122_v2  ;;  %s534_s1 = scalar_lea.vmem %s2696_s0, %s1828_s24  ;;  %s1827_s24 = sshll.u32 %s528_s22, 3 }
  0x20   : > { %1937 = vmatprep.subr.bf16.mxu1 %v2245_v1  ;;  %v2405_v4 = vld [vmem:[%s534_s1] sm:$0xff] }
  0x21   : > { %v557_v5 = vpack.c.bf16 %v2405_v4, %v2405_v4 }
  0x23   : > { %1934 = vmatmul.mubr.msk.bf16.vlgmr.msra.gmra.mrb[0].mxu1 %vm562_vm1, %v557_v5 }
  0x24   : > { %1938 = vmatpush3.bf16.msra.mxu1 %v2123_v3  ;;  %1941 = vmatprep.mubr.msk.bf16.mxu1 %vm2246_vm0, %v2245_v1 }
  0x25   : > { %1939 = vmatprep.subr.bf16.mxu1 %v2245_v1 }
  0x28   : > { %1940 = vmatpush3.bf16.msra.mxu1 %v2124_v6 }
  0x29   : > { %1945 = vmatprep.subr.bf16.mxu1 %v2245_v1 }
  0x2b   : > { %1942 = vmatmul.mubr.msk.bf16.vlgmr.msra.gmra.mrb[4].mxu1 %vm562_vm1, %v557_v5 }
  0x2c   : > { %1946 = vmatpush3.bf16.msra.mxu1 %v2125_v7  ;;  %1949 = vmatprep.mubr.msk.bf16.mxu1 %vm2246_vm0, %v2245_v1 }
  0x2d   : > { %1947 = vmatprep.subr.bf16.mxu1 %v2245_v1 }
  0x30   : > { %1948 = vmatpush3.bf16.msra.mxu1 %v2126_v8 }
  0x31   : > { %1953 = vmatprep.subr.bf16.mxu1 %v2245_v1 }
  0x33   : > { %1950 = vmatmul.mubr.msk.bf16.vlgmr.msra.gmra.mrb[8].mxu1 %vm562_vm1, %v557_v5 }
  0x34   : > { %1955 = vmatprep.mubr.msk.bf16.mxu1 %vm2246_vm0, %v2245_v1 }
  0xf6   : > { %v642_v9 = vpop.f32.mrb[0].mxu1 }
  0xf7   : > { %v1935_v10 = vpop.f32.mrb[1].mxu1  ;;  %v2436_v19 = vpack.c.bf16 %v642_v9, %v642_v9 }
  0xf8   : > { %v645_v11 = vpop.f32.mrb[2].mxu1 }
  0xf9   : > { %v1936_v12 = vpop.f32.mrb[3].mxu1 }
  0xfe   : > { %v694_v13 = vpop.f32.mrb[4].mxu1 }
  0xff   : > { %v2431_v14 = vpack.c.bf16 %v694_v13, %v694_v13  ;;  %v1943_v15 = vpop.f32.mrb[5].mxu1 }
 0x100   : > { %v697_v16 = vpop.f32.mrb[6].mxu1 }
 0x101   : > { %866 = vrot.lane.b32.xlu0 %v2431_v14, %s2247_s21  ;;  %v1944_v17 = vpop.f32.mrb[7].mxu1  ;;  %v759_v18 = vsel %vm562_vm1, %v2431_v14, 0 }
 0x102   : > { %1954 = vmatpush3.bf16.xpose.msra.mxu1 %v759_v18 }
 0x103   : > { %1965 = vmatprep.subr.bf16.mxu1 %v2245_v1 }
 0x105   : > { %863 = vrot.lane.b32.xlu0 %v2436_v19, %s2247_s21 }
 0x106   : > { %v746_v20 = vpop.f32.mrb[8].mxu1 }
 0x107   : > { %v2440_v21 = vpack.c.bf16 %v746_v20, %v746_v20  ;;  %v1951_v22 = vpop.f32.mrb[9].mxu1 }
 0x108   : > { %v749_v23 = vpop.f32.mrb[10].mxu1 }
 0x109   : > { %1956 = vmatmul.mubr.msk.bf16.vlgmr.msra.gmra.mrb[12].mxu1 %vm562_vm1, %v2436_v19  ;;  %925 = vrot.lane.b32.xlu0 %v2440_v21, %s2247_s21  ;;  %v1952_v24 = vpop.f32.mrb[11].mxu1  ;;  %v817_v25 = vsel %vm815_vm2, %v2440_v21, 0 }
 0x10a   : > { %1967 = vmatprep.mubr.msk.bf16.mxu1 %vm2246_vm0, %v2245_v1  ;;  %1960 = vmatpush3.bf16.msra.mxu0 %v817_v25 }
 0x10b   : > { %1971 = vmatprep.subr.bf16.mxu0 %v2245_v1 }
 0x10d   : > { %1088 = vrot.lane.b32.xlu0 %v2431_v14, %s2248_s27 }
 0x173   : > { %v867_v26 = vpop.permute.xlu0 %866 }
 0x174   : > { %v872_v27 = vsel %vm562_vm1, %v867_v26, 0 }
 0x175   : > { %1966 = vmatpush3.bf16.xpose.msra.mxu1 %v872_v27 }
 0x176   : > { %1977 = vmatprep.subr.bf16.mxu1 %v2245_v1 }
 0x177   : > { %v864_v28 = vpop.permute.xlu0 %863 }
 0x17b   : > { %v926_v43 = vpop.permute.xlu0 %925 }
 0x17c   : > { %1968 = vmatmul.mubr.msk.bf16.vlgmr.msra.gmra.mrb[16].mxu1 %vm562_vm1, %v864_v28  ;;  %v931_v44 = vsel %vm815_vm2, %v926_v43, 0 }
 0x17d   : > { %1981 = vmatprep.mubr.msk.bf16.mxu1 %vm2246_vm0, %v2245_v1  ;;  %1978 = vmatpush3.bf16.msra.mxu1 %v2129_v55 }
 0x17e   : > { %1979 = vmatprep.subr.bf16.mxu1 %v2245_v1 }
 0x17f   : > { %v1089_v57 = vpop.permute.xlu0 %1088 }
 0x180   : > { %v1094_v15 = vsel %vm562_vm1, %v1089_v57, 0 }
 0x181   : > { %1980 = vmatpush3.bf16.msra.mxu1 %v2130_v56 }
 0x182   : > { %1993 = vmatprep.subr.bf16.mxu1 %v2245_v1 }
 0x1dc   : > { %v795_v29 = vpop.f32.mrb[12].mxu1 }
 0x1dd   : > { %v1957_v30 = vpop.f32.mrb[13].mxu1  ;;  %v802_v31 = vsel %vm801_vm3, %v795_v29, -inf }
 0x1de   : > { %803 = vmax.xlane.f32.xlu1 %v802_v31  ;;  %v798_v32 = vpop.f32.mrb[14].mxu1 }
 0x1df   : > { %v1958_v33 = vpop.f32.mrb[15].mxu1 }
 0x24f   : > { %v908_v34 = vpop.f32.mrb[16].mxu1 }
 0x250   : > { %v1969_v35 = vpop.f32.mrb[17].mxu1  ;;  %v914_v36 = vsel %vm801_vm3, %v908_v34, -inf }
 0x251   : > { %915 = vmax.xlane.f32.xlu1 %v914_v36  ;;  %v911_v37 = vpop.f32.mrb[18].mxu1 }
 0x252   : > { %v1970_v38 = vpop.f32.mrb[19].mxu1 }
 0x26b   : > { %v804_v39 = vpop.xlane.xlu1 %803 }
 0x26c   : > { %v805_v40 = vsub.f32 %v795_v29, %v804_v39 }
 0x26e   : > { %v806_v41 = vmul.f32 1.442695, %v805_v40  ;;  %v2131_v40 = vld [vmem:[%s2673_s4 + $0x20] sm:$0xff]  }
 0x270   : > { %2145 = vpow2.f32 %v806_v41  ;;  %v2132_v41 = vld [vmem:[%s2673_s4 + $0x28] sm:$0xff]  }
 0x27a   : > { %v2146_v42 = vpop.eup %2145 }
 0x27b   : > { %v808_v45 = vsel %vm801_vm3, %v2146_v42, 0.0  ;;  %v811_v46 = vpack.c.bf16 %v2146_v42, %v2146_v42 }
 0x27c   : > { %809 = vadd.xlane.f32.xlu0 %v808_v45 }
 0x27d   : > { %1962 = vmatmul.mubr.msk.bf16.vlgmr.msra.gmra.mrb[0].mxu0 %vm801_vm3, %v811_v46 }
 0x27e   : > { %1972 = vmatpush3.bf16.msra.mxu0 %v931_v44  ;;  %1973 = vmatprep.mubr.msk.bf16.mxu0 %vm2246_vm0, %v2245_v1 }
 0x27f   : > { %1985 = vmatprep.subr.bf16.mxu0 %v2245_v1 }
 0x292   : > { %1146 = vrot.lane.b32.xlu0 %v2440_v21, %s2248_s27 }
 0x296   : > { %1253 = vrot.lane.b32.xlu0 %v2436_v19, %s2249_s28 }
 0x2de   : > { %v916_v47 = vpop.xlane.xlu1 %915 }
 0x2df   : > { %v917_v48 = vsub.f32 %v908_v34, %v916_v47 }
 0x2e1   : > { %v918_v49 = vmul.f32 1.442695, %v917_v48 }
 0x2e3   : > { %2147 = vpow2.f32 %v918_v49 }
 0x2ed   : > { %v2148_v50 = vpop.eup %2147 }
 0x2ee   : > { %v920_v52 = vsel %vm801_vm3, %v2148_v50, 0.0  ;;  %v923_v53 = vpack.c.bf16 %v2148_v50, %v2148_v50 }
 0x2ef   : > { %921 = vadd.xlane.f32.xlu1 %v920_v52 }
 0x2f0   : > { %1974 = vmatmul.mubr.msk.bf16.vlgmr.msra.gmra.mrb[4].mxu0 %vm801_vm3, %v923_v53 }
 0x2f1   : > { %1986 = vmatpush3.bf16.msra.mxu0 %v2127_v51  ;;  %1989 = vmatprep.mubr.msk.bf16.mxu0 %vm2246_vm0, %v2245_v1 }
 0x2f2   : > { %1987 = vmatprep.subr.bf16.mxu0 %v2245_v1 }
 0x2f5   : > { %1988 = vmatpush3.bf16.msra.mxu0 %v2128_v54 }
 0x2f6   : > { %1999 = vmatprep.subr.bf16.mxu0 %v2245_v1 }
 0x300   : > { %1086 = vrot.lane.b32.xlu1 %v2436_v19, %s2248_s27  ;;  %s530_s27 = scalar_lea.vmem [#allocation3], %s1827_s24  ;;  %s2169_s24 = sshll.u32 %s2250_s16, 4  ;;  %s2170_s24 = int_to_ptr.vmem [resolvable:$false] %s2169_s24 }
 0x301   : > { %s1691_s20 = sshll.u32 %s530_s27, 4  ;;  %s2171_s17 = scalar_lea.vmem %s2170_s24, 256  ;;  %s2623_s20 = int_to_ptr.vmem [resolvable:$true] %s1691_s20 }
 0x302   : > { %s2165_s1 = scalar_lea.vmem %s2623_s20, 128  ;;  %p2172_p1 = scmp.lt.s32.totalorder %s2623_s20, %s2170_s24 }
 0x303   : > { %p2166_p12 = scmp.ne.s32.totalorder %s2623_s20, %s2165_s1  ;;  %p2173_p2 = scmp.lt.s32.totalorder %s2171_s17, %s2165_s1 }
 0x305   : > { %p2167_p13 = pnand %p2166_p12, %p2366_p4  ;;  %p2174_p3 = por %p2173_p2, %p2172_p1 }
 0x307   : > { %p2168_p0 = pneg %p2167_p13 }
 0x309   : > { %v810_v58 = vpop.xlane.xlu0 %809  ;;  %p2175_p5 = pnand %p2174_p3, %p2168_p0 }
 0x30a   : > { %2149 = vrcp.f32 %v810_v58 }
 0x30d   : > { %v1147_v63 = vpop.permute.xlu0 %1146 }
 0x30e   : > { %v1152_v5 = vsel %vm815_vm2, %v1147_v63, 0 }
 0x314   : > { %v2150_v59 = vpop.eup %2149 }
 0x350   : > { %v853_v60 = vpop.f32.mrb[0].mxu0 }
 0x351   : > { %v860_v61 = vmul.f32 %v2150_v59, %v853_v60  ;;  %v1963_v62 = vpop.f32.mrb[1].mxu0 }
 0x352   : > { %v856_v0 = vpop.f32.mrb[2].mxu0  ;;  %v2133_v62 = vld [vmem:[%s2673_s4 + $0x30] sm:$0xff]  }
 0x353   : > { %v861_v2 = vpack.c.bf16 %v860_v61, %v860_v61  ;;  %v1964_v3 = vpop.f32.mrb[3].mxu0 }
 0x355   : > { %1990 = vmatmul.mubr.msk.bf16.vlgmr.msra.gmra.mrb[8].mxu0 %vm562_vm1, %v861_v2 }
 0x356   : > { %2000 = vmatpush3.bf16.msra.mxu0 %v1152_v5  ;;  %2001 = vmatprep.mubr.msk.bf16.mxu0 %vm2246_vm0, %v2245_v1 }
 0x357   : > { %2013 = vmatprep.subr.bf16.mxu0 %v2245_v1 }
 0x37c   : > { %v922_v6 = vpop.xlane.xlu1 %921 }
 0x37d   : > { %2151 = vrcp.f32 %v922_v6  ;;  %v2134_v6 = vld [vmem:[%s2673_s4 + $0x38] sm:$0xff]  }
 0x380   : > { %v1087_v16 = vpop.permute.xlu1 %1086 }
 0x387   : > { %v2152_v7 = vpop.eup %2151 }
 0x3c3   : > { %v967_v8 = vpop.f32.mrb[4].mxu0 }
 0x3c4   : > { %v974_v9 = vmul.f32 %v2152_v7, %v967_v8  ;;  %v1975_v10 = vpop.f32.mrb[5].mxu0 }
 0x3c5   : > { %v970_v11 = vpop.f32.mrb[6].mxu0 }
 0x3c6   : > { %v975_v12 = vpack.c.bf16 %v974_v9, %v974_v9  ;;  %v1976_v13 = vpop.f32.mrb[7].mxu0 }
 0x3c8   : > { %1982 = vmatmul.mubr.msk.bf16.vlgmr.msra.gmra.mrb[20].mxu1 %vm562_vm1, %v975_v12 }
 0x3c9   : > { %1994 = vmatpush3.bf16.xpose.msra.mxu1 %v1094_v15  ;;  %1995 = vmatprep.mubr.msk.bf16.mxu1 %vm2246_vm0, %v2245_v1 }
 0x3ca   : > { %2005 = vmatprep.subr.bf16.mxu1 %v2245_v1 }
 0x3d0   : > { %1996 = vmatmul.mubr.msk.bf16.vlgmr.msra.gmra.mrb[24].mxu1 %vm562_vm1, %v1087_v16 }
 0x3d1   : > { %2009 = vmatprep.mubr.msk.bf16.mxu1 %vm2246_vm0, %v2245_v1  ;;  %2006 = vmatpush3.bf16.msra.mxu1 %v2131_v40 }
 0x3d2   : > { %2007 = vmatprep.subr.bf16.mxu1 %v2245_v1 }
 0x3d5   : > { %2008 = vmatpush3.bf16.msra.mxu1 %v2132_v41 }
 0x3d6   : > { %2019 = vmatprep.subr.bf16.mxu1 %v2245_v1 }
 0x428   : > { %v1080_v17 = vpop.f32.mrb[8].mxu0 }
 0x429   : > { %v1991_v18 = vpop.f32.mrb[9].mxu0 }
 0x42a   : > { %v1083_v19 = vpop.f32.mrb[10].mxu0 }
 0x42b   : > { %v1992_v20 = vpop.f32.mrb[11].mxu0 }
 0x49b   : > { %v1025_v22 = vpop.f32.mrb[20].mxu1 }
 0x49c   : > { %v2504_v23 = vadd.f32 %v1080_v17, %v1025_v22  ;;  %v1983_v24 = vpop.f32.mrb[21].mxu1  ;;  %v1420_v17 = vld [vmem:[#allocation2] sm:$0xff] }
 0x49d   : > { %v1028_v25 = vpop.f32.mrb[22].mxu1  ;;  %v1858_v24 = vld [vmem:[%s2674_s5] ss:$0 sm:$0xff] }
 0x49e   : > { %v1984_v26 = vpop.f32.mrb[23].mxu1 }
 0x4a3   : > { %v1130_v27 = vpop.f32.mrb[24].mxu1 }
 0x4a4   : > { %v1997_v28 = vpop.f32.mrb[25].mxu1  ;;  %v1136_v29 = vsel %vm801_vm3, %v1130_v27, -inf }
 0x4a5   : > { %1137 = vmax.xlane.f32.xlu1 %v1136_v29  ;;  %v1133_v30 = vpop.f32.mrb[26].mxu1 }
 0x4a6   : > { %v1998_v31 = vpop.f32.mrb[27].mxu1 }
 0x4b6   : > { %1255 = vrot.lane.b32.xlu1 %v2431_v14, %s2249_s28  ;;  %v1254_v14 = vpop.permute.xlu0 %1253 }
 0x532   : > { %v1138_v32 = vpop.xlane.xlu1 %1137 }
 0x533   : > { %v1139_v33 = vsub.f32 %v1130_v27, %v1138_v32 }
 0x535   : > { %v1140_v34 = vmul.f32 1.442695, %v1139_v33 }
 0x536   : > { %v1256_v36 = vpop.permute.xlu1 %1255 }
 0x537   : > { %2153 = vpow2.f32 %v1140_v34  ;;  %v1261_v39 = vsel %vm562_vm1, %v1256_v36, 0  ;;  %v2135_v34 = vld [vmem:[%s2677_s8] sm:$0xff]   ;;  %v2138_v36 = vld [vmem:[%s2679_s10 + $0x8] sm:$0xff]  }
 0x541   : > { %v2154_v35 = vpop.eup %2153 }
 0x542   : > { %v1142_v37 = vsel %vm801_vm3, %v2154_v35, 0.0  ;;  %v1145_v38 = vpack.c.bf16 %v2154_v35, %v2154_v35  ;;  %v2136_v35 = vld [vmem:[%s2677_s8 + $0x8] sm:$0xff]  }
 0x543   : > { %1143 = vadd.xlane.f32.xlu0 %v1142_v37  ;;  %v2139_v37 = vld [vmem:[%s2679_s10 + $0x10] sm:$0xff]  }
 0x544   : > { %2002 = vmatmul.mubr.msk.bf16.vlgmr.msra.gmra.mrb[12].mxu0 %vm801_vm3, %v1145_v38  ;;  %v2140_v38 = vld [vmem:[%s2679_s10 + $0x18] sm:$0xff]  }
 0x545   : > { %2014 = vmatpush3.bf16.xpose.msra.mxu0 %v1261_v39  ;;  %2015 = vmatprep.mubr.msk.bf16.mxu0 %vm2246_vm0, %v2245_v1  ;;  %v2141_v39 = vld [vmem:[%s2679_s10 + $0x20] sm:$0xff]  }
 0x546   : > { %2025 = vmatprep.subr.bf16.mxu0 %v2245_v1 }
 0x54c   : > { %2016 = vmatmul.mubr.msk.bf16.vlgmr.msra.gmra.mrb[16].mxu0 %vm562_vm1, %v1254_v14  ;;  %v2142_v14 = vld [vmem:[%s2679_s10 + $0x28] sm:$0xff]  }
 0x54d   : > { %2029 = vmatprep.mubr.msk.bf16.mxu0 %vm2246_vm0, %v2245_v1  ;;  %2026 = vmatpush3.bf16.msra.mxu0 %v2133_v62 }
 0x54e   : > { %2027 = vmatprep.subr.bf16.mxu0 %v2245_v1 }
 0x551   : > { %2028 = vmatpush3.bf16.msra.mxu0 %v2134_v6 }
 0x552   : > { %2041 = vmatprep.subr.bf16.mxu0 %v2245_v1 }
 0x559   : > { %1313 = vrot.lane.b32.xlu0 %v2440_v21, %s2249_s28  ;;  %s1678_s28 = scalar_lea.sflag [#allocation4], %s528_s22 }
 0x5d0   : > { %v1144_v42 = vpop.xlane.xlu0 %1143 }
 0x5d1   : > { %2155 = vrcp.f32 %v1144_v42 }
 0x5d4   : > { %v1314_v47 = vpop.permute.xlu0 %1313 }
 0x5d5   : > { %v1319_v51 = vsel %vm815_vm2, %v1314_v47, 0 }
 0x5db   : > { %v2156_v43 = vpop.eup %2155 }
 0x617   : > { %v1188_v44 = vpop.f32.mrb[12].mxu0 }
 0x618   : > { %v1195_v45 = vmul.f32 %v2156_v43, %v1188_v44  ;;  %v2003_v46 = vpop.f32.mrb[13].mxu0  ;;  %v1859_v44 = vld [vmem:[%s2675_s6] ss:$0 sm:$0xff] }
 0x619   : > { %v1191_v48 = vpop.f32.mrb[14].mxu0  ;;  %v1860_v46 = vld [vmem:[%s2676_s7] ss:$0 sm:$0xff] }
 0x61a   : > { %v1196_v49 = vpack.c.bf16 %v1195_v45, %v1195_v45  ;;  %v2004_v50 = vpop.f32.mrb[15].mxu0 }
 0x61b   : > { %v2143_v50 = vld [vmem:[%s2679_s10 + $0x30] sm:$0xff]  }
 0x61c   : > { %2010 = vmatmul.mubr.msk.bf16.vlgmr.msra.gmra.mrb[28].mxu1 %vm562_vm1, %v1196_v49 }
 0x61d   : > { %2020 = vmatpush3.bf16.msra.mxu1 %v1319_v51  ;;  %2021 = vmatprep.mubr.msk.bf16.mxu1 %vm2246_vm0, %v2245_v1  ;;  %v2144_v51 = vld [vmem:[%s2679_s10 + $0x38] sm:$0xff]  }
 0x61e   : > { %2033 = vmatprep.subr.bf16.mxu1 %v2245_v1 }
 0x61f   : > { %v1297_v21 = vpop.f32.mrb[16].mxu0 }
 0x620   : > { %v2017_v52 = vpop.f32.mrb[17].mxu0  ;;  %v1303_v53 = vsel %vm801_vm3, %v1297_v21, -inf }
 0x621   : > { %1304 = vmax.xlane.f32.xlu1 %v1303_v53  ;;  %v1300_v54 = vpop.f32.mrb[18].mxu0 }
 0x622   : > { %v2018_v55 = vpop.f32.mrb[19].mxu0 }
 0x6ae   : > { %v1305_v56 = vpop.xlane.xlu1 %1304 }
 0x6af   : > { %v1306_v57 = vsub.f32 %v1297_v21, %v1305_v56  ;;  %v1861_v21 = vld [vmem:[%s2678_s9] ss:$0 sm:$0xff] }
 0x6b1   : > { %v1307_v58 = vmul.f32 1.442695, %v1306_v57 }
 0x6b3   : > { %2157 = vpow2.f32 %v1307_v58 }
 0x6bd   : > { %v2158_v59 = vpop.eup %2157 }
 0x6be   : > { %v1309_v60 = vsel %vm801_vm3, %v2158_v59, 0.0  ;;  %v1312_v61 = vpack.c.bf16 %v2158_v59, %v2158_v59 }
 0x6bf   : > { %1310 = vadd.xlane.f32.xlu1 %v1309_v60 }
 0x6c0   : > { %2022 = vmatmul.mubr.msk.bf16.vlgmr.msra.gmra.mrb[32].mxu1 %vm801_vm3, %v1312_v61 }
 0x6c1   : > { %2037 = vmatprep.mubr.msk.bf16.mxu1 %vm2246_vm0, %v2245_v1  ;;  %2034 = vmatpush3.bf16.msra.mxu1 %v2135_v34 }
 0x6c2   : > { %2035 = vmatprep.subr.bf16.mxu1 %v2245_v1 }
 0x6c5   : > { %2036 = vmatpush3.bf16.msra.mxu1 %v2136_v35 }
 0x6ef   : > { %v1246_v63 = vpop.f32.mrb[28].mxu1 }
 0x6f0   : > { %v1252_v0 = vadd.f32 %v1246_v63, %v2504_v23  ;;  %v2011_v2 = vpop.f32.mrb[29].mxu1 }
 0x6f1   : > { %v1249_v3 = vpop.f32.mrb[30].mxu1 }
 0x6f2   : > { %v2012_v5 = vpop.f32.mrb[31].mxu1 }
 0x74c   : > { %v1311_v7 = vpop.xlane.xlu1 %1310 }
 0x74d   : > { %2159 = vrcp.f32 %v1311_v7 }
 0x757   : > { %v2160_v8 = vpop.eup %2159 }
 0x793   : > { %v1355_v9 = vpop.f32.mrb[32].mxu1 }
 0x794   : > { %v1362_v10 = vmul.f32 %v2160_v8, %v1355_v9  ;;  %v2023_v11 = vpop.f32.mrb[33].mxu1 }
 0x795   : > { %v1358_v12 = vpop.f32.mrb[34].mxu1 }
 0x796   : > { %v1363_v13 = vpack.c.bf16 %v1362_v10, %v1362_v10  ;;  %v2024_v15 = vpop.f32.mrb[35].mxu1 }
 0x798   : > { %2030 = vmatmul.mubr.msk.bf16.vlgmr.msra.gmra.mrb[20].mxu0 %vm562_vm1, %v1363_v13  ;;  %v1874_v13 = vld [vmem:[%s2681_s12] ss:$0 sm:$0xff] }
 0x799   : > { %2057 = vmatprep.mubr.msk.bf16.mxu0 %vm2246_vm0, %v2245_v1 }
 0x86b   : > { %v1413_v16 = vpop.f32.mrb[20].mxu0 }
 0x86c   : > { %v1419_v18 = vadd.f32 %v1413_v16, %v1252_v0  ;;  %v2031_v19 = vpop.f32.mrb[21].mxu0  ;;  %v1875_v16 = vld [vmem:[%s2682_s13] ss:$0 sm:$0xff] }
 0x86d   : > { %v1416_v20 = vpop.f32.mrb[22].mxu0 }
 0x86e   : > { %v1421_v22 = vadd.f32 %v1420_v17, %v1419_v18  ;;  %v2032_v23 = vpop.f32.mrb[23].mxu0 }
 0x870   : > { %1422 = vst.msk [vmem:[#allocation2] sm:$0xff] %vm562_vm1, %v1421_v22 }
 0x877   : > { %v1426_v25 = vld [vmem:[#allocation2] sm:$0xff] }
 0x878   : > { %v1434_v26 = vadd.f32 %v1858_v24, %v1426_v25 }
 0x87a   : > { %v1435_v27 = vadd.f32 %v1434_v26, %v2405_v4  ;;  %v2137_v4 = vld [vmem:[%s2679_s10] sm:$0xff]  }
 0x87b   : > { %2042 = vmatpush3.bf16.msra.mxu0 %v2137_v4 }
 0x87c   : > { %v1438_v28 = vsel %vm562_vm1, %v1435_v27, 0.0  ;;  %2043 = vmatprep.subr.bf16.mxu0 %v2245_v1 }
 0x87d   : > { %1439 = vadd.xlane.f32.xlu1 %v1438_v28 }
 0x87f   : > { %2044 = vmatpush3.bf16.msra.mxu0 %v2138_v36 }
 0x880   : > { %2045 = vmatprep.subr.bf16.mxu0 %v2245_v1 }
 0x883   : > { %2046 = vmatpush3.bf16.msra.mxu0 %v2139_v37 }
 0x884   : > { %2047 = vmatprep.subr.bf16.mxu0 %v2245_v1 }
 0x887   : > { %2048 = vmatpush3.bf16.msra.mxu0 %v2140_v38 }
 0x888   : > { %2049 = vmatprep.subr.bf16.mxu0 %v2245_v1 }
 0x88b   : > { %2050 = vmatpush3.bf16.msra.mxu0 %v2141_v39 }
 0x88c   : > { %2051 = vmatprep.subr.bf16.mxu0 %v2245_v1 }
 0x88f   : > { %2052 = vmatpush3.bf16.msra.mxu0 %v2142_v14 }
 0x890   : > { %2053 = vmatprep.subr.bf16.mxu0 %v2245_v1 }
 0x893   : > { %2054 = vmatpush3.bf16.msra.mxu0 %v2143_v50 }
 0x894   : > { %2055 = vmatprep.subr.bf16.mxu0 %v2245_v1  ;;  %v1865_v1 = vld [vmem:[%s2680_s11] ss:$0 sm:$0xff] }
 0x897   : > { %2056 = vmatpush3.bf16.msra.mxu0 %v2144_v51 }
 0x90a   : > { %v1440_v29 = vpop.xlane.xlu1 %1439 }
 0x90b   : > { %v1442_v30 = vmul.f32 0.03125, %v1440_v29 }
 0x90d   : > { %v1443_v31 = vsub.f32 %v1435_v27, %v1442_v30 }
 0x90f   : > { %v1444_v32 = vmul.f32 %v1443_v31, %v1443_v31 }
 0x911   : > { %v1445_v33 = vsel %vm562_vm1, %v1444_v32, 0.0 }
 0x912   : > { %1446 = vadd.xlane.f32.xlu0 %v1445_v33 }
 0x99f   : > { %v1447_v40 = vpop.xlane.xlu0 %1446 }
 0x9a0   : > { %v1448_v41 = vmul.f32 0.03125, %v1447_v40 }
 0x9a2   : > { %v1449_v42 = vadd.f32 1e-05, %v1448_v41 }
 0x9a4   : > { %2161 = vrsqrt.f32 %v1449_v42 }
 0x9ae   : > { %v2162_v43 = vpop.eup %2161 }
 0x9af   : > { %v1451_v45 = vmul.f32 %v2162_v43, %v1443_v31 }
 0x9b1   : > { %v1458_v47 = vmul.f32 %v1859_v44, %v1451_v45 }
 0x9b3   : > { %v1465_v48 = vadd.f32 %v1860_v46, %v1458_v47 }
 0x9b5   : > { %v1466_v49 = vpack.c.bf16 %v1465_v48, %v1465_v48 }
 0x9b7   : > { %2038 = vmatmul.mubr.msk.bf16.vlgmr.msra.gmra.mrb[36].mxu1 %vm562_vm1, %v1466_v49 }
 0xa8a   : > { %v1527_v52 = vpop.f32.mrb[36].mxu1 }
 0xa8b   : > { %v1528_v53 = vadd.f32 %v1861_v21, %v1527_v52  ;;  %v2039_v54 = vpop.f32.mrb[37].mxu1 }
 0xa8c   : > { %v1530_v55 = vpop.f32.mrb[38].mxu1 }
 0xa8d   : > { %v1533_v56 = vmax.f32 %v1528_v53, 0.0  ;;  %v2040_v57 = vpop.f32.mrb[39].mxu1 }
 0xa8f   : > { %v1534_v58 = vpack.c.bf16 %v1533_v56, %v1533_v56 }
 0xa91   : > { %2058 = vmatmul.mubr.bf16.vlgmr.msra.gmra.mrb[24].mxu0 %v1534_v58 }
 0xb64   : > { %v1640_v59 = vpop.f32.mrb[24].mxu0 }
 0xb65   : > { %v1641_v60 = vadd.f32 %v1865_v1, %v1640_v59  ;;  %v2059_v61 = vpop.f32.mrb[25].mxu0 }
 0xb66   : > { %v1643_v62 = vpop.f32.mrb[26].mxu0 }
 0xb67   : > { %v2060_v63 = vpop.f32.mrb[27].mxu0  ;;  %v1646_v0 = vadd.f32 %v1641_v60, %v1465_v48 }
 0xb69   : > { %v1649_v2 = vsel %vm562_vm1, %v1646_v0, 0.0 }
 0xb6a   : > { %1650 = vadd.xlane.f32.xlu1 %v1649_v2 }
 0xbf7   : > { %v1651_v3 = vpop.xlane.xlu1 %1650 }
 0xbf8   : > { %v1652_v5 = vmul.f32 0.03125, %v1651_v3 }
 0xbfa   : > { %v1653_v6 = vsub.f32 %v1646_v0, %v1652_v5 }
 0xbfc   : > { %v1654_v7 = vmul.f32 %v1653_v6, %v1653_v6 }
 0xbfe   : > { %v1655_v8 = vsel %vm562_vm1, %v1654_v7, 0.0 }
 0xbff   : > { %1656 = vadd.xlane.f32.xlu1 %v1655_v8 }
 0xc8c   : > { %v1657_v9 = vpop.xlane.xlu1 %1656 }
 0xc8d   : > { %v1658_v10 = vmul.f32 0.03125, %v1657_v9 }
 0xc8f   : > { %v1659_v11 = vadd.f32 1e-05, %v1658_v10 }
 0xc91   : > { %2163 = vrsqrt.f32 %v1659_v11 }
 0xc9b   : > { %v2164_v12 = vpop.eup %2163 }
 0xc9c   : > { %v1661_v15 = vmul.f32 %v2164_v12, %v1653_v6 }
 0xc9e   : > { %v1668_v17 = vmul.f32 %v1874_v13, %v1661_v15 }
 0xca0   : > { %v1675_v18 = vadd.f32 %v1875_v16, %v1668_v17 }
 0xca2   : > { %1676 = vst.msk [vmem:[%s530_s27] sm:$0xff] %vm562_vm1, %v1675_v18 }
 0xca3   : > { %2178 = shalt.err (!%p2175_p5)
}
 0xca4   : > { %s2179_s0 = scalar_lea.hbm %s2621_s3, 128  ;;  %s2183_s21 = scalar_lea.hbm %s2683_s14, 256 }
 0xca5   : > { %p2180_p6 = scmp.ne.s32.totalorder %s2621_s3, %s2179_s0  ;;  %p2184_p10 = scmp.lt.u32.totalorder %s2621_s3, %s2683_s14 }
 0xca6   : > { %p2185_p11 = scmp.lt.u32.totalorder %s2183_s21, %s2179_s0  ;;  %p2187_p13 = scmp.lt.u32.totalorder %s2179_s0, %s2621_s3 }
 0xca7   : > { %p2181_p7 = pnand %p2180_p6, %p2366_p4 }
 0xca8   : > { %p2186_p12 = por %p2185_p11, %p2184_p10 }
 0xca9   : > { %p2182_p9 = pneg %p2181_p7 }
 0xcaa   : > { %p2188_p0 = por %p2187_p13, %p2186_p12 }
 0xcac   : > { %p2189_p1 = pnand %p2188_p0, %p2182_p9 }
 0xcae   : > { %2192 = shalt.err (!%p2189_p1)
}
 0xcaf   : > { %2061 = dma.vmem_to_hbm [thread:$0]  (%p2366_p4), %s2623_s20, 128, %s2621_s3, %s1678_s28  }
 0xcb0 PF: > { %p2067_p2 = scmp.ge.s32.totalorder %s2243_s18, 2  ;;  %s1703_s1 = sand.u32 1, %s2223_s29  }
 0xcb1   : > { %s1704_s16 = scalar_lea.sflag [#allocation4], %s1703_s1 }
 0xcb2   : > { %p2064_p3 = pnand %p2067_p2, %p2373_p8 }
 0xcb4   : > { %2218 = dma.done.wait (!%p2064_p3), %s1704_s16, 128  }
 0xcb5   : > { %2220 = vsyncadd (!%p2064_p3), %s1704_s16, 4294967168  ;;  %s27_s18 = sadd.s32 1, %s2243_s18   ;;  %s2698_s16 = sld [smem:[#allocation6_spill]] }
 0xcb6   : > { %p24_p5 = scmp.ge.s32.totalorder %s27_s18, 4   ;;  %s2699_s17 = sld [smem:[#allocation7_spill]] }
 0xcb7   : > { %s2700_s29 = smov %s2227_s30  ;;  %s2701_s30 = smov %s2231_s15 }
 0xcb8   : > { %s2702_s15 = smov %s2379_s26  ;;  %26 = sbr.rel (!%p24_p5) target bundleno = 9 (0x9), region = 131 }
 0xcbf   :  { %1709 = vsyncpa [#allocation4], 1 }
 0xcc0   :  { %1711 = vsyncpa [#allocation4 + $0x1], 1 }

// kernel: tpu_custom_call.1
= control target key start
LH: loop header
LB: loop body
LE: loop exit
PB: predicated region body
PF: predicated region fallthrough
CT: control target
= control target key end

     0   :  { %s2669_s0 = inlined_call_operand.vmem [shape: f32[2,8,32], index: 0, kind: input, shape index: {}]   ;;  %s2670_s1 = inlined_call_operand.vmem [shape: bf16[1,32,128], index: 1, kind: input, shape index: {}]   ;;  %s2671_s2 = inlined_call_operand.vmem [shape: bf16[1,32,128], index: 2, kind: input, shape index: {}]   ;;  %s2672_s3 = inlined_call_operand.vmem [shape: bf16[1,32,128], index: 3, kind: input, shape index: {}]   ;;  %s2673_s4 = inlined_call_operand.vmem [shape: bf16[1,128,32], index: 4, kind: input, shape index: {}]   ;;  %s2674_s5 = inlined_call_operand.vmem [shape: f32[1,32], index: 5, kind: input, shape index: {}]   ;;  %s2675_s6 = inlined_call_operand.vmem [shape: f32[1,32], index: 6, kind: input, shape index: {}]   ;;  %s2676_s7 = inlined_call_operand.vmem [shape: f32[1,32], index: 7, kind: input, shape index: {}]   ;;  %s2677_s8 = inlined_call_operand.vmem [shape: bf16[32,128], index: 8, kind: input, shape index: {}]   ;;  %s2678_s9 = inlined_call_operand.vmem [shape: f32[1,128], index: 9, kind: input, shape index: {}]   ;;  %s2679_s10 = inlined_call_operand.vmem [shape: bf16[128,32], index: 10, kind: input, shape index: {}]   ;;  %s2680_s11 = inlined_call_operand.vmem [shape: f32[1,32], index: 11, kind: input, shape index: {}]   ;;  %s2681_s12 = inlined_call_operand.vmem [shape: f32[1,32], index: 12, kind: input, shape index: {}]   ;;  %s2682_s13 = inlined_call_operand.vmem [shape: f32[1,32], index: 13, kind: input, shape index: {}]   ;;  %s2683_s14 = inlined_call_operand.hbm [shape: f32[2,8,32], index: 14, kind: output, shape index: {}]  }
   0x1   :  { %2686 = sst [smem:[#allocation8_spill]] %s2669_s0 }
   0x2   :  { %2687 = sst [smem:[#allocation9_spill]] %s2670_s1 }
   0x3   :  { %2688 = sst [smem:[#allocation10_spill]] %s2671_s2 }
   0x4   :  { %2689 = sst [smem:[#allocation11_spill]] %s2672_s3 }
   0x5   :  { %19 = vsyncpa [#allocation4], 0 }
   0x6   :  { %21 = vsyncpa [#allocation4 + $0x1], 0  ;;  %s2326_s29 = smov 0   ;;  %s2328_s30 = smov 0  }
   0x7   :  { %s2330_s15 = smov 0   ;;  %s2332_s16 = smov 0  }
   0x8   :  { %s2334_s17 = smov 0   ;;  %s2336_s18 = smov 0  }
   0x9 LB: > { %2690 = sst [smem:[#allocation6_spill]] %s2239_s17  ;;  %s1818_s19 = sadd.s32 4294967295, %s2243_s18   ;;  %s2243_s18 = sphi %s2336_s18, %s27_s18   ;;  %s2239_s17 = sphi %s2334_s17, %s2699_s17   ;;  %s2235_s16 = sphi %s2332_s16, %s2698_s16   ;;  %s2231_s15 = sphi %s2330_s15, %s2702_s15   ;;  %s2227_s30 = sphi %s2328_s30, %s2701_s30   ;;  %s2223_s29 = sphi %s2326_s29, %s2700_s29  }
   0xa   : > { %s1819_s20 = sadd.s32 4294967294, %s2243_s18   ;;  %s39_s21 = sadd.s32 1, %s2239_s17 }
   0xb   : > { %s365_s22 = sadd.s32 1, %s2231_s15  ;;  %p41_p0 = scmp.ge.s32.totalorder %s39_s21, 2 }
   0xc   : > { %p375_p1 = scmp.ne.s32.totalorder %s2231_s15, %s2227_s30  ;;  %p376_p2 = scmp.eq.s32.totalorder %s1818_s19, 1 }
   0xd   : > { %p381_p3 = scmp.ne.s32.totalorder %s2227_s30, %s2223_s29  ;;  %s2704_s21 = smov (%p41_p0, %s39_s21), 0 }
   0xe   : > { %2691 = sst [smem:[#allocation7_spill]] %s2704_s21  ;;  %p2366_p4 = por %p376_p2, %p375_p1 }
   0xf   : > { %p382_p5 = scmp.eq.s32.totalorder %s1819_s20, 1  ;;  %s362_s24 = ssub.s32 %s2239_s17, %s2704_s21 }
  0x10   : > { %p1826_p6 = scmp.ge.s32.totalorder %s2243_s18, 1  ;;  %p363_p7 = scmp.eq.s32.totalorder %s362_s24, 0 }
  0x11   : > { %p2373_p8 = por %p382_p5, %p381_p3  ;;  %p466_p9 = scmp.lt.s32.totalorder %s2243_s18, 3 }
  0x12   : > { %s2379_s26 = scalar_select %p363_p7, %s2231_s15, %s365_s22  }
  0x13   : > { %p467_p10 = pnand %p1826_p6, %p466_p9 }
  0x14   : > { %s2694_s1 = sld [smem:[#allocation9_spill]] (!%p467_p10)  ;;  %v2245_v1 = vmov (!%p467_p10), 0.0   ;;  %vm2246_vm0 = vmmov (!%p467_p10), 0   ;;  %p531_p11 = scmp.lt.s32.totalorder (!%p467_p10), %s2235_s16, 1  ;;  %vm562_vm1 = vcmask (!%p467_p10), 261120   ;;  %vm815_vm2 = vcmask (!%p467_p10), 1043456  }
  0x15   : > { %470 = sbr.rel (%p467_p10) target bundleno = 3248 (0xcb0), region = 76  ;;  %1929 = vmatprep.subr.bf16.mxu1 (!%p467_p10), %v2245_v1  ;;  %1959 = vmatprep.subr.bf16.mxu0 (!%p467_p10), %v2245_v1  ;;  %563 = vst.msk [vmem:[#allocation2] sm:$0xff] (!%p467_p10), %vm562_vm1, %v2245_v1  ;;  %s2695_s2 = sld [smem:[#allocation10_spill]] (!%p467_p10)  ;;  %vm801_vm3 = vcmask (!%p467_p10), 64512   ;;  %v2127_v51 = vld [vmem:[%s2673_s4] sm:$0xff] (!%p467_p10)   ;;  %v2128_v54 = vld [vmem:[%s2673_s4 + $0x8] sm:$0xff] (!%p467_p10)  }
  0x16   : > { %1933 = vmatprep.mubr.msk.bf16.mxu1 (!%p467_p10), %vm2246_vm0, %v2245_v1  ;;  %1961 = vmatprep.mubr.msk.bf16.mxu0 (!%p467_p10), %vm2246_vm0, %v2245_v1  ;;  %s2696_s0 = sld [smem:[#allocation8_spill]] (!%p467_p10)  ;;  %s2697_s3 = sld [smem:[#allocation11_spill]] (!%p467_p10)  ;;  %v2129_v55 = vld [vmem:[%s2673_s4 + $0x10] sm:$0xff] (!%p467_p10)   ;;  %v2130_v56 = vld [vmem:[%s2673_s4 + $0x18] sm:$0xff] (!%p467_p10)  }
  0x17   : > { %s2247_s21 = smov (!%p467_p10), 96   ;;  %s2248_s27 = smov (!%p467_p10), 64  }
  0x18   : > { %s2249_s28 = smov (!%p467_p10), 32   ;;  %s1877_s19 = sshll.u32 (!%p467_p10), %s2235_s16, 7 }
  0x1a   : > { %v2121_v0 = vld [vmem:[%s2694_s1] sm:$0xff] (!%p467_p10)   ;;  %v2122_v2 = vld [vmem:[%s2694_s1 + $0x8] sm:$0xff] (!%p467_p10)  }
  0x1b   : > { %1930 = vmatpush3.bf16.msra.mxu1 (!%p467_p10), %v2121_v0  ;;  %v2123_v3 = vld [vmem:[%s2695_s2] sm:$0xff] (!%p467_p10)   ;;  %v2124_v6 = vld [vmem:[%s2695_s2 + $0x8] sm:$0xff] (!%p467_p10)  }
  0x1c   : > { %1931 = vmatprep.subr.bf16.mxu1 %v2245_v1  ;;  %s532_s22 = scalar_select %p531_p11, %s2235_s16, 1  ;;  %v2125_v7 = vld [vmem:[%s2697_s3] sm:$0xff]   ;;  %v2126_v8 = vld [vmem:[%s2697_s3 + $0x8] sm:$0xff]  }
  0x1d   : > { %s2621_s3 = scalar_lea.hbm %s2683_s14, %s1877_s19  ;;  %s2250_s16 = smov [#allocation3]  }
  0x1e   : > { %s1828_s24 = sshll.u32 %s532_s22, 3  ;;  %s528_s22 = sand.u32 1, %s2227_s30  }
  0x1f   : > { %1932 = vmatpush3.bf16.msra.mxu1 %v2122_v2  ;;  %s534_s1 = scalar_lea.vmem %s2696_s0, %s1828_s24  ;;  %s1827_s24 = sshll.u32 %s528_s22, 3 }
  0x20   : > { %1937 = vmatprep.subr.bf16.mxu1 %v2245_v1  ;;  %v2405_v4 = vld [vmem:[%s534_s1] sm:$0xff] }
  0x21   : > { %v557_v5 = vpack.c.bf16 %v2405_v4, %v2405_v4 }
  0x23   : > { %1934 = vmatmul.mubr.msk.bf16.vlgmr.msra.gmra.mrb[0].mxu1 %vm562_vm1, %v557_v5 }
  0x24   : > { %1938 = vmatpush3.bf16.msra.mxu1 %v2123_v3  ;;  %1941 = vmatprep.mubr.msk.bf16.mxu1 %vm2246_vm0, %v2245_v1 }
  0x25   : > { %1939 = vmatprep.subr.bf16.mxu1 %v2245_v1 }
  0x28   : > { %1940 = vmatpush3.bf16.msra.mxu1 %v2124_v6 }
  0x29   : > { %1945 = vmatprep.subr.bf16.mxu1 %v2245_v1 }
  0x2b   : > { %1942 = vmatmul.mubr.msk.bf16.vlgmr.msra.gmra.mrb[4].mxu1 %vm562_vm1, %v557_v5 }
  0x2c   : > { %1946 = vmatpush3.bf16.msra.mxu1 %v2125_v7  ;;  %1949 = vmatprep.mubr.msk.bf16.mxu1 %vm2246_vm0, %v2245_v1 }
  0x2d   : > { %1947 = vmatprep.subr.bf16.mxu1 %v2245_v1 }
  0x30   : > { %1948 = vmatpush3.bf16.msra.mxu1 %v2126_v8 }
  0x31   : > { %1953 = vmatprep.subr.bf16.mxu1 %v2245_v1 }
  0x33   : > { %1950 = vmatmul.mubr.msk.bf16.vlgmr.msra.gmra.mrb[8].mxu1 %vm562_vm1, %v557_v5 }
  0x34   : > { %1955 = vmatprep.mubr.msk.bf16.mxu1 %vm2246_vm0, %v2245_v1 }
  0xf6   : > { %v642_v9 = vpop.f32.mrb[0].mxu1 }
  0xf7   : > { %v1935_v10 = vpop.f32.mrb[1].mxu1  ;;  %v2436_v19 = vpack.c.bf16 %v642_v9, %v642_v9 }
  0xf8   : > { %v645_v11 = vpop.f32.mrb[2].mxu1 }
  0xf9   : > { %v1936_v12 = vpop.f32.mrb[3].mxu1 }
  0xfe   : > { %v694_v13 = vpop.f32.mrb[4].mxu1 }
  0xff   : > { %v2431_v14 = vpack.c.bf16 %v694_v13, %v694_v13  ;;  %v1943_v15 = vpop.f32.mrb[5].mxu1 }
 0x100   : > { %v697_v16 = vpop.f32.mrb[6].mxu1 }
 0x101   : > { %866 = vrot.lane.b32.xlu0 %v2431_v14, %s2247_s21  ;;  %v1944_v17 = vpop.f32.mrb[7].mxu1  ;;  %v759_v18 = vsel %vm562_vm1, %v2431_v14, 0 }
 0x102   : > { %1954 = vmatpush3.bf16.xpose.msra.mxu1 %v759_v18 }
 0x103   : > { %1965 = vmatprep.subr.bf16.mxu1 %v2245_v1 }
 0x105   : > { %863 = vrot.lane.b32.xlu0 %v2436_v19, %s2247_s21 }
 0x106   : > { %v746_v20 = vpop.f32.mrb[8].mxu1 }
 0x107   : > { %v2440_v21 = vpack.c.bf16 %v746_v20, %v746_v20  ;;  %v1951_v22 = vpop.f32.mrb[9].mxu1 }
 0x108   : > { %v749_v23 = vpop.f32.mrb[10].mxu1 }
 0x109   : > { %1956 = vmatmul.mubr.msk.bf16.vlgmr.msra.gmra.mrb[12].mxu1 %vm562_vm1, %v2436_v19  ;;  %925 = vrot.lane.b32.xlu0 %v2440_v21, %s2247_s21  ;;  %v1952_v24 = vpop.f32.mrb[11].mxu1  ;;  %v817_v25 = vsel %vm815_vm2, %v2440_v21, 0 }
 0x10a   : > { %1967 = vmatprep.mubr.msk.bf16.mxu1 %vm2246_vm0, %v2245_v1  ;;  %1960 = vmatpush3.bf16.msra.mxu0 %v817_v25 }
 0x10b   : > { %1971 = vmatprep.subr.bf16.mxu0 %v2245_v1 }
 0x10d   : > { %1088 = vrot.lane.b32.xlu0 %v2431_v14, %s2248_s27 }
 0x173   : > { %v867_v26 = vpop.permute.xlu0 %866 }
 0x174   : > { %v872_v27 = vsel %vm562_vm1, %v867_v26, 0 }
 0x175   : > { %1966 = vmatpush3.bf16.xpose.msra.mxu1 %v872_v27 }
 0x176   : > { %1977 = vmatprep.subr.bf16.mxu1 %v2245_v1 }
 0x177   : > { %v864_v28 = vpop.permute.xlu0 %863 }
 0x17b   : > { %v926_v43 = vpop.permute.xlu0 %925 }
 0x17c   : > { %1968 = vmatmul.mubr.msk.bf16.vlgmr.msra.gmra.mrb[16].mxu1 %vm562_vm1, %v864_v28  ;;  %v931_v44 = vsel %vm815_vm2, %v926_v43, 0 }
 0x17d   : > { %1981 = vmatprep.mubr.msk.bf16.mxu1 %vm2246_vm0, %v2245_v1  ;;  %1978 = vmatpush3.bf16.msra.mxu1 %v2129_v55 }
 0x17e   : > { %1979 = vmatprep.subr.bf16.mxu1 %v2245_v1 }
 0x17f   : > { %v1089_v57 = vpop.permute.xlu0 %1088 }
 0x180   : > { %v1094_v15 = vsel %vm562_vm1, %v1089_v57, 0 }
 0x181   : > { %1980 = vmatpush3.bf16.msra.mxu1 %v2130_v56 }
 0x182   : > { %1993 = vmatprep.subr.bf16.mxu1 %v2245_v1 }
 0x1dc   : > { %v795_v29 = vpop.f32.mrb[12].mxu1 }
 0x1dd   : > { %v1957_v30 = vpop.f32.mrb[13].mxu1  ;;  %v802_v31 = vsel %vm801_vm3, %v795_v29, -inf }
 0x1de   : > { %803 = vmax.xlane.f32.xlu1 %v802_v31  ;;  %v798_v32 = vpop.f32.mrb[14].mxu1 }
 0x1df   : > { %v1958_v33 = vpop.f32.mrb[15].mxu1 }
 0x24f   : > { %v908_v34 = vpop.f32.mrb[16].mxu1 }
 0x250   : > { %v1969_v35 = vpop.f32.mrb[17].mxu1  ;;  %v914_v36 = vsel %vm801_vm3, %v908_v34, -inf }
 0x251   : > { %915 = vmax.xlane.f32.xlu1 %v914_v36  ;;  %v911_v37 = vpop.f32.mrb[18].mxu1 }
 0x252   : > { %v1970_v38 = vpop.f32.mrb[19].mxu1 }
 0x26b   : > { %v804_v39 = vpop.xlane.xlu1 %803 }
 0x26c   : > { %v805_v40 = vsub.f32 %v795_v29, %v804_v39 }
 0x26e   : > { %v806_v41 = vmul.f32 1.442695, %v805_v40  ;;  %v2131_v40 = vld [vmem:[%s2673_s4 + $0x20] sm:$0xff]  }
 0x270   : > { %2145 = vpow2.f32 %v806_v41  ;;  %v2132_v41 = vld [vmem:[%s2673_s4 + $0x28] sm:$0xff]  }
 0x27a   : > { %v2146_v42 = vpop.eup %2145 }
 0x27b   : > { %v808_v45 = vsel %vm801_vm3, %v2146_v42, 0.0  ;;  %v811_v46 = vpack.c.bf16 %v2146_v42, %v2146_v42 }
 0x27c   : > { %809 = vadd.xlane.f32.xlu0 %v808_v45 }
 0x27d   : > { %1962 = vmatmul.mubr.msk.bf16.vlgmr.msra.gmra.mrb[0].mxu0 %vm801_vm3, %v811_v46 }
 0x27e   : > { %1972 = vmatpush3.bf16.msra.mxu0 %v931_v44  ;;  %1973 = vmatprep.mubr.msk.bf16.mxu0 %vm2246_vm0, %v2245_v1 }
 0x27f   : > { %1985 = vmatprep.subr.bf16.mxu0 %v2245_v1 }
 0x292   : > { %1146 = vrot.lane.b32.xlu0 %v2440_v21, %s2248_s27 }
 0x296   : > { %1253 = vrot.lane.b32.xlu0 %v2436_v19, %s2249_s28 }
 0x2de   : > { %v916_v47 = vpop.xlane.xlu1 %915 }
 0x2df   : > { %v917_v48 = vsub.f32 %v908_v34, %v916_v47 }
 0x2e1   : > { %v918_v49 = vmul.f32 1.442695, %v917_v48 }
 0x2e3   : > { %2147 = vpow2.f32 %v918_v49 }
 0x2ed   : > { %v2148_v50 = vpop.eup %2147 }
 0x2ee   : > { %v920_v52 = vsel %vm801_vm3, %v2148_v50, 0.0  ;;  %v923_v53 = vpack.c.bf16 %v2148_v50, %v2148_v50 }
 0x2ef   : > { %921 = vadd.xlane.f32.xlu1 %v920_v52 }
 0x2f0   : > { %1974 = vmatmul.mubr.msk.bf16.vlgmr.msra.gmra.mrb[4].mxu0 %vm801_vm3, %v923_v53 }
 0x2f1   : > { %1986 = vmatpush3.bf16.msra.mxu0 %v2127_v51  ;;  %1989 = vmatprep.mubr.msk.bf16.mxu0 %vm2246_vm0, %v2245_v1 }
 0x2f2   : > { %1987 = vmatprep.subr.bf16.mxu0 %v2245_v1 }
 0x2f5   : > { %1988 = vmatpush3.bf16.msra.mxu0 %v2128_v54 }
 0x2f6   : > { %1999 = vmatprep.subr.bf16.mxu0 %v2245_v1 }
 0x300   : > { %1086 = vrot.lane.b32.xlu1 %v2436_v19, %s2248_s27  ;;  %s530_s27 = scalar_lea.vmem [#allocation3], %s1827_s24  ;;  %s2169_s24 = sshll.u32 %s2250_s16, 4  ;;  %s2170_s24 = int_to_ptr.vmem [resolvable:$false] %s2169_s24 }
 0x301   : > { %s1691_s20 = sshll.u32 %s530_s27, 4  ;;  %s2171_s17 = scalar_lea.vmem %s2170_s24, 256  ;;  %s2623_s20 = int_to_ptr.vmem [resolvable:$true] %s1691_s20 }
 0x302   : > { %s2165_s1 = scalar_lea.vmem %s2623_s20, 128  ;;  %p2172_p1 = scmp.lt.s32.totalorder %s2623_s20, %s2170_s24 }
 0x303   : > { %p2166_p12 = scmp.ne.s32.totalorder %s2623_s20, %s2165_s1  ;;  %p2173_p2 = scmp.lt.s32.totalorder %s2171_s17, %s2165_s1 }
 0x305   : > { %p2167_p13 = pnand %p2166_p12, %p2366_p4  ;;  %p2174_p3 = por %p2173_p2, %p2172_p1 }
 0x307   : > { %p2168_p0 = pneg %p2167_p13 }
 0x309   : > { %v810_v58 = vpop.xlane.xlu0 %809  ;;  %p2175_p5 = pnand %p2174_p3, %p2168_p0 }
 0x30a   : > { %2149 = vrcp.f32 %v810_v58 }
 0x30d   : > { %v1147_v63 = vpop.permute.xlu0 %1146 }
 0x30e   : > { %v1152_v5 = vsel %vm815_vm2, %v1147_v63, 0 }
 0x314   : > { %v2150_v59 = vpop.eup %2149 }
 0x350   : > { %v853_v60 = vpop.f32.mrb[0].mxu0 }
 0x351   : > { %v860_v61 = vmul.f32 %v2150_v59, %v853_v60  ;;  %v1963_v62 = vpop.f32.mrb[1].mxu0 }
 0x352   : > { %v856_v0 = vpop.f32.mrb[2].mxu0  ;;  %v2133_v62 = vld [vmem:[%s2673_s4 + $0x30] sm:$0xff]  }
 0x353   : > { %v861_v2 = vpack.c.bf16 %v860_v61, %v860_v61  ;;  %v1964_v3 = vpop.f32.mrb[3].mxu0 }
 0x355   : > { %1990 = vmatmul.mubr.msk.bf16.vlgmr.msra.gmra.mrb[8].mxu0 %vm562_vm1, %v861_v2 }
 0x356   : > { %2000 = vmatpush3.bf16.msra.mxu0 %v1152_v5  ;;  %2001 = vmatprep.mubr.msk.bf16.mxu0 %vm2246_vm0, %v2245_v1 }
 0x357   : > { %2013 = vmatprep.subr.bf16.mxu0 %v2245_v1 }
 0x37c   : > { %v922_v6 = vpop.xlane.xlu1 %921 }
 0x37d   : > { %2151 = vrcp.f32 %v922_v6  ;;  %v2134_v6 = vld [vmem:[%s2673_s4 + $0x38] sm:$0xff]  }
 0x380   : > { %v1087_v16 = vpop.permute.xlu1 %1086 }
 0x387   : > { %v2152_v7 = vpop.eup %2151 }
 0x3c3   : > { %v967_v8 = vpop.f32.mrb[4].mxu0 }
 0x3c4   : > { %v974_v9 = vmul.f32 %v2152_v7, %v967_v8  ;;  %v1975_v10 = vpop.f32.mrb[5].mxu0 }
 0x3c5   : > { %v970_v11 = vpop.f32.mrb[6].mxu0 }
 0x3c6   : > { %v975_v12 = vpack.c.bf16 %v974_v9, %v974_v9  ;;  %v1976_v13 = vpop.f32.mrb[7].mxu0 }
 0x3c8   : > { %1982 = vmatmul.mubr.msk.bf16.vlgmr.msra.gmra.mrb[20].mxu1 %vm562_vm1, %v975_v12 }
 0x3c9   : > { %1994 = vmatpush3.bf16.xpose.msra.mxu1 %v1094_v15  ;;  %1995 = vmatprep.mubr.msk.bf16.mxu1 %vm2246_vm0, %v2245_v1 }
 0x3ca   : > { %2005 = vmatprep.subr.bf16.mxu1 %v2245_v1 }
 0x3d0   : > { %1996 = vmatmul.mubr.msk.bf16.vlgmr.msra.gmra.mrb[24].mxu1 %vm562_vm1, %v1087_v16 }
 0x3d1   : > { %2009 = vmatprep.mubr.msk.bf16.mxu1 %vm2246_vm0, %v2245_v1  ;;  %2006 = vmatpush3.bf16.msra.mxu1 %v2131_v40 }
 0x3d2   : > { %2007 = vmatprep.subr.bf16.mxu1 %v2245_v1 }
 0x3d5   : > { %2008 = vmatpush3.bf16.msra.mxu1 %v2132_v41 }
 0x3d6   : > { %2019 = vmatprep.subr.bf16.mxu1 %v2245_v1 }
 0x428   : > { %v1080_v17 = vpop.f32.mrb[8].mxu0 }
 0x429   : > { %v1991_v18 = vpop.f32.mrb[9].mxu0 }
 0x42a   : > { %v1083_v19 = vpop.f32.mrb[10].mxu0 }
 0x42b   : > { %v1992_v20 = vpop.f32.mrb[11].mxu0 }
 0x49b   : > { %v1025_v22 = vpop.f32.mrb[20].mxu1 }
 0x49c   : > { %v2504_v23 = vadd.f32 %v1080_v17, %v1025_v22  ;;  %v1983_v24 = vpop.f32.mrb[21].mxu1  ;;  %v1420_v17 = vld [vmem:[#allocation2] sm:$0xff] }
 0x49d   : > { %v1028_v25 = vpop.f32.mrb[22].mxu1  ;;  %v1858_v24 = vld [vmem:[%s2674_s5] ss:$0 sm:$0xff] }
 0x49e   : > { %v1984_v26 = vpop.f32.mrb[23].mxu1 }
 0x4a3   : > { %v1130_v27 = vpop.f32.mrb[24].mxu1 }
 0x4a4   : > { %v1997_v28 = vpop.f32.mrb[25].mxu1  ;;  %v1136_v29 = vsel %vm801_vm3, %v1130_v27, -inf }
 0x4a5   : > { %1137 = vmax.xlane.f32.xlu1 %v1136_v29  ;;  %v1133_v30 = vpop.f32.mrb[26].mxu1 }
 0x4a6   : > { %v1998_v31 = vpop.f32.mrb[27].mxu1 }
 0x4b6   : > { %1255 = vrot.lane.b32.xlu1 %v2431_v14, %s2249_s28  ;;  %v1254_v14 = vpop.permute.xlu0 %1253 }
 0x532   : > { %v1138_v32 = vpop.xlane.xlu1 %1137 }
 0x533   : > { %v1139_v33 = vsub.f32 %v1130_v27, %v1138_v32 }
 0x535   : > { %v1140_v34 = vmul.f32 1.442695, %v1139_v33 }
 0x536   : > { %v1256_v36 = vpop.permute.xlu1 %1255 }
 0x537   : > { %2153 = vpow2.f32 %v1140_v34  ;;  %v1261_v39 = vsel %vm562_vm1, %v1256_v36, 0  ;;  %v2135_v34 = vld [vmem:[%s2677_s8] sm:$0xff]   ;;  %v2138_v36 = vld [vmem:[%s2679_s10 + $0x8] sm:$0xff]  }
 0x541   : > { %v2154_v35 = vpop.eup %2153 }
 0x542   : > { %v1142_v37 = vsel %vm801_vm3, %v2154_v35, 0.0  ;;  %v1145_v38 = vpack.c.bf16 %v2154_v35, %v2154_v35  ;;  %v2136_v35 = vld [vmem:[%s2677_s8 + $0x8] sm:$0xff]  }
 0x543   : > { %1143 = vadd.xlane.f32.xlu0 %v1142_v37  ;;  %v2139_v37 = vld [vmem:[%s2679_s10 + $0x10] sm:$0xff]  }
 0x544   : > { %2002 = vmatmul.mubr.msk.bf16.vlgmr.msra.gmra.mrb[12].mxu0 %vm801_vm3, %v1145_v38  ;;  %v2140_v38 = vld [vmem:[%s2679_s10 + $0x18] sm:$0xff]  }
 0x545   : > { %2014 = vmatpush3.bf16.xpose.msra.mxu0 %v1261_v39  ;;  %2015 = vmatprep.mubr.msk.bf16.mxu0 %vm2246_vm0, %v2245_v1  ;;  %v2141_v39 = vld [vmem:[%s2679_s10 + $0x20] sm:$0xff]  }
 0x546   : > { %2025 = vmatprep.subr.bf16.mxu0 %v2245_v1 }
 0x54c   : > { %2016 = vmatmul.mubr.msk.bf16.vlgmr.msra.gmra.mrb[16].mxu0 %vm562_vm1, %v1254_v14  ;;  %v2142_v14 = vld [vmem:[%s2679_s10 + $0x28] sm:$0xff]  }
 0x54d   : > { %2029 = vmatprep.mubr.msk.bf16.mxu0 %vm2246_vm0, %v2245_v1  ;;  %2026 = vmatpush3.bf16.msra.mxu0 %v2133_v62 }
 0x54e   : > { %2027 = vmatprep.subr.bf16.mxu0 %v2245_v1 }
 0x551   : > { %2028 = vmatpush3.bf16.msra.mxu0 %v2134_v6 }
 0x552   : > { %2041 = vmatprep.subr.bf16.mxu0 %v2245_v1 }
 0x559   : > { %1313 = vrot.lane.b32.xlu0 %v2440_v21, %s2249_s28  ;;  %s1678_s28 = scalar_lea.sflag [#allocation4], %s528_s22 }
 0x5d0   : > { %v1144_v42 = vpop.xlane.xlu0 %1143 }
 0x5d1   : > { %2155 = vrcp.f32 %v1144_v42 }
 0x5d4   : > { %v1314_v47 = vpop.permute.xlu0 %1313 }
 0x5d5   : > { %v1319_v51 = vsel %vm815_vm2, %v1314_v47, 0 }
 0x5db   : > { %v2156_v43 = vpop.eup %2155 }
 0x617   : > { %v1188_v44 = vpop.f32.mrb[12].mxu0 }
 0x618   : > { %v1195_v45 = vmul.f32 %v2156_v43, %v1188_v44  ;;  %v2003_v46 = vpop.f32.mrb[13].mxu0  ;;  %v1859_v44 = vld [vmem:[%s2675_s6] ss:$0 sm:$0xff] }
 0x619   : > { %v1191_v48 = vpop.f32.mrb[14].mxu0  ;;  %v1860_v46 = vld [vmem:[%s2676_s7] ss:$0 sm:$0xff] }
 0x61a   : > { %v1196_v49 = vpack.c.bf16 %v1195_v45, %v1195_v45  ;;  %v2004_v50 = vpop.f32.mrb[15].mxu0 }
 0x61b   : > { %v2143_v50 = vld [vmem:[%s2679_s10 + $0x30] sm:$0xff]  }
 0x61c   : > { %2010 = vmatmul.mubr.msk.bf16.vlgmr.msra.gmra.mrb[28].mxu1 %vm562_vm1, %v1196_v49 }
 0x61d   : > { %2020 = vmatpush3.bf16.msra.mxu1 %v1319_v51  ;;  %2021 = vmatprep.mubr.msk.bf16.mxu1 %vm2246_vm0, %v2245_v1  ;;  %v2144_v51 = vld [vmem:[%s2679_s10 + $0x38] sm:$0xff]  }
 0x61e   : > { %2033 = vmatprep.subr.bf16.mxu1 %v2245_v1 }
 0x61f   : > { %v1297_v21 = vpop.f32.mrb[16].mxu0 }
 0x620   : > { %v2017_v52 = vpop.f32.mrb[17].mxu0  ;;  %v1303_v53 = vsel %vm801_vm3, %v1297_v21, -inf }
 0x621   : > { %1304 = vmax.xlane.f32.xlu1 %v1303_v53  ;;  %v1300_v54 = vpop.f32.mrb[18].mxu0 }
 0x622   : > { %v2018_v55 = vpop.f32.mrb[19].mxu0 }
 0x6ae   : > { %v1305_v56 = vpop.xlane.xlu1 %1304 }
 0x6af   : > { %v1306_v57 = vsub.f32 %v1297_v21, %v1305_v56  ;;  %v1861_v21 = vld [vmem:[%s2678_s9] ss:$0 sm:$0xff] }
 0x6b1   : > { %v1307_v58 = vmul.f32 1.442695, %v1306_v57 }
 0x6b3   : > { %2157 = vpow2.f32 %v1307_v58 }
 0x6bd   : > { %v2158_v59 = vpop.eup %2157 }
 0x6be   : > { %v1309_v60 = vsel %vm801_vm3, %v2158_v59, 0.0  ;;  %v1312_v61 = vpack.c.bf16 %v2158_v59, %v2158_v59 }
 0x6bf   : > { %1310 = vadd.xlane.f32.xlu1 %v1309_v60 }
 0x6c0   : > { %2022 = vmatmul.mubr.msk.bf16.vlgmr.msra.gmra.mrb[32].mxu1 %vm801_vm3, %v1312_v61 }
 0x6c1   : > { %2037 = vmatprep.mubr.msk.bf16.mxu1 %vm2246_vm0, %v2245_v1  ;;  %2034 = vmatpush3.bf16.msra.mxu1 %v2135_v34 }
 0x6c2   : > { %2035 = vmatprep.subr.bf16.mxu1 %v2245_v1 }
 0x6c5   : > { %2036 = vmatpush3.bf16.msra.mxu1 %v2136_v35 }
 0x6ef   : > { %v1246_v63 = vpop.f32.mrb[28].mxu1 }
 0x6f0   : > { %v1252_v0 = vadd.f32 %v1246_v63, %v2504_v23  ;;  %v2011_v2 = vpop.f32.mrb[29].mxu1 }
 0x6f1   : > { %v1249_v3 = vpop.f32.mrb[30].mxu1 }
 0x6f2   : > { %v2012_v5 = vpop.f32.mrb[31].mxu1 }
 0x74c   : > { %v1311_v7 = vpop.xlane.xlu1 %1310 }
 0x74d   : > { %2159 = vrcp.f32 %v1311_v7 }
 0x757   : > { %v2160_v8 = vpop.eup %2159 }
 0x793   : > { %v1355_v9 = vpop.f32.mrb[32].mxu1 }
 0x794   : > { %v1362_v10 = vmul.f32 %v2160_v8, %v1355_v9  ;;  %v2023_v11 = vpop.f32.mrb[33].mxu1 }
 0x795   : > { %v1358_v12 = vpop.f32.mrb[34].mxu1 }
 0x796   : > { %v1363_v13 = vpack.c.bf16 %v1362_v10, %v1362_v10  ;;  %v2024_v15 = vpop.f32.mrb[35].mxu1 }
 0x798   : > { %2030 = vmatmul.mubr.msk.bf16.vlgmr.msra.gmra.mrb[20].mxu0 %vm562_vm1, %v1363_v13  ;;  %v1874_v13 = vld [vmem:[%s2681_s12] ss:$0 sm:$0xff] }
 0x799   : > { %2057 = vmatprep.mubr.msk.bf16.mxu0 %vm2246_vm0, %v2245_v1 }
 0x86b   : > { %v1413_v16 = vpop.f32.mrb[20].mxu0 }
 0x86c   : > { %v1419_v18 = vadd.f32 %v1413_v16, %v1252_v0  ;;  %v2031_v19 = vpop.f32.mrb[21].mxu0  ;;  %v1875_v16 = vld [vmem:[%s2682_s13] ss:$0 sm:$0xff] }
 0x86d   : > { %v1416_v20 = vpop.f32.mrb[22].mxu0 }
 0x86e   : > { %v1421_v22 = vadd.f32 %v1420_v17, %v1419_v18  ;;  %v2032_v23 = vpop.f32.mrb[23].mxu0 }
 0x870   : > { %1422 = vst.msk [vmem:[#allocation2] sm:$0xff] %vm562_vm1, %v1421_v22 }
 0x877   : > { %v1426_v25 = vld [vmem:[#allocation2] sm:$0xff] }
 0x878   : > { %v1434_v26 = vadd.f32 %v1858_v24, %v1426_v25 }
 0x87a   : > { %v1435_v27 = vadd.f32 %v1434_v26, %v2405_v4  ;;  %v2137_v4 = vld [vmem:[%s2679_s10] sm:$0xff]  }
 0x87b   : > { %2042 = vmatpush3.bf16.msra.mxu0 %v2137_v4 }
 0x87c   : > { %v1438_v28 = vsel %vm562_vm1, %v1435_v27, 0.0  ;;  %2043 = vmatprep.subr.bf16.mxu0 %v2245_v1 }
 0x87d   : > { %1439 = vadd.xlane.f32.xlu1 %v1438_v28 }
 0x87f   : > { %2044 = vmatpush3.bf16.msra.mxu0 %v2138_v36 }
 0x880   : > { %2045 = vmatprep.subr.bf16.mxu0 %v2245_v1 }
 0x883   : > { %2046 = vmatpush3.bf16.msra.mxu0 %v2139_v37 }
 0x884   : > { %2047 = vmatprep.subr.bf16.mxu0 %v2245_v1 }
 0x887   : > { %2048 = vmatpush3.bf16.msra.mxu0 %v2140_v38 }
 0x888   : > { %2049 = vmatprep.subr.bf16.mxu0 %v2245_v1 }
 0x88b   : > { %2050 = vmatpush3.bf16.msra.mxu0 %v2141_v39 }
 0x88c   : > { %2051 = vmatprep.subr.bf16.mxu0 %v2245_v1 }
 0x88f   : > { %2052 = vmatpush3.bf16.msra.mxu0 %v2142_v14 }
 0x890   : > { %2053 = vmatprep.subr.bf16.mxu0 %v2245_v1 }
 0x893   : > { %2054 = vmatpush3.bf16.msra.mxu0 %v2143_v50 }
 0x894   : > { %2055 = vmatprep.subr.bf16.mxu0 %v2245_v1  ;;  %v1865_v1 = vld [vmem:[%s2680_s11] ss:$0 sm:$0xff] }
 0x897   : > { %2056 = vmatpush3.bf16.msra.mxu0 %v2144_v51 }
 0x90a   : > { %v1440_v29 = vpop.xlane.xlu1 %1439 }
 0x90b   : > { %v1442_v30 = vmul.f32 0.03125, %v1440_v29 }
 0x90d   : > { %v1443_v31 = vsub.f32 %v1435_v27, %v1442_v30 }
 0x90f   : > { %v1444_v32 = vmul.f32 %v1443_v31, %v1443_v31 }
 0x911   : > { %v1445_v33 = vsel %vm562_vm1, %v1444_v32, 0.0 }
 0x912   : > { %1446 = vadd.xlane.f32.xlu0 %v1445_v33 }
 0x99f   : > { %v1447_v40 = vpop.xlane.xlu0 %1446 }
 0x9a0   : > { %v1448_v41 = vmul.f32 0.03125, %v1447_v40 }
 0x9a2   : > { %v1449_v42 = vadd.f32 1e-05, %v1448_v41 }
 0x9a4   : > { %2161 = vrsqrt.f32 %v1449_v42 }
 0x9ae   : > { %v2162_v43 = vpop.eup %2161 }
 0x9af   : > { %v1451_v45 = vmul.f32 %v2162_v43, %v1443_v31 }
 0x9b1   : > { %v1458_v47 = vmul.f32 %v1859_v44, %v1451_v45 }
 0x9b3   : > { %v1465_v48 = vadd.f32 %v1860_v46, %v1458_v47 }
 0x9b5   : > { %v1466_v49 = vpack.c.bf16 %v1465_v48, %v1465_v48 }
 0x9b7   : > { %2038 = vmatmul.mubr.msk.bf16.vlgmr.msra.gmra.mrb[36].mxu1 %vm562_vm1, %v1466_v49 }
 0xa8a   : > { %v1527_v52 = vpop.f32.mrb[36].mxu1 }
 0xa8b   : > { %v1528_v53 = vadd.f32 %v1861_v21, %v1527_v52  ;;  %v2039_v54 = vpop.f32.mrb[37].mxu1 }
 0xa8c   : > { %v1530_v55 = vpop.f32.mrb[38].mxu1 }
 0xa8d   : > { %v1533_v56 = vmax.f32 %v1528_v53, 0.0  ;;  %v2040_v57 = vpop.f32.mrb[39].mxu1 }
 0xa8f   : > { %v1534_v58 = vpack.c.bf16 %v1533_v56, %v1533_v56 }
 0xa91   : > { %2058 = vmatmul.mubr.bf16.vlgmr.msra.gmra.mrb[24].mxu0 %v1534_v58 }
 0xb64   : > { %v1640_v59 = vpop.f32.mrb[24].mxu0 }
 0xb65   : > { %v1641_v60 = vadd.f32 %v1865_v1, %v1640_v59  ;;  %v2059_v61 = vpop.f32.mrb[25].mxu0 }
 0xb66   : > { %v1643_v62 = vpop.f32.mrb[26].mxu0 }
 0xb67   : > { %v2060_v63 = vpop.f32.mrb[27].mxu0  ;;  %v1646_v0 = vadd.f32 %v1641_v60, %v1465_v48 }
 0xb69   : > { %v1649_v2 = vsel %vm562_vm1, %v1646_v0, 0.0 }
 0xb6a   : > { %1650 = vadd.xlane.f32.xlu1 %v1649_v2 }
 0xbf7   : > { %v1651_v3 = vpop.xlane.xlu1 %1650 }
 0xbf8   : > { %v1652_v5 = vmul.f32 0.03125, %v1651_v3 }
 0xbfa   : > { %v1653_v6 = vsub.f32 %v1646_v0, %v1652_v5 }
 0xbfc   : > { %v1654_v7 = vmul.f32 %v1653_v6, %v1653_v6 }
 0xbfe   : > { %v1655_v8 = vsel %vm562_vm1, %v1654_v7, 0.0 }
 0xbff   : > { %1656 = vadd.xlane.f32.xlu1 %v1655_v8 }
 0xc8c   : > { %v1657_v9 = vpop.xlane.xlu1 %1656 }
 0xc8d   : > { %v1658_v10 = vmul.f32 0.03125, %v1657_v9 }
 0xc8f   : > { %v1659_v11 = vadd.f32 1e-05, %v1658_v10 }
 0xc91   : > { %2163 = vrsqrt.f32 %v1659_v11 }
 0xc9b   : > { %v2164_v12 = vpop.eup %2163 }
 0xc9c   : > { %v1661_v15 = vmul.f32 %v2164_v12, %v1653_v6 }
 0xc9e   : > { %v1668_v17 = vmul.f32 %v1874_v13, %v1661_v15 }
 0xca0   : > { %v1675_v18 = vadd.f32 %v1875_v16, %v1668_v17 }
 0xca2   : > { %1676 = vst.msk [vmem:[%s530_s27] sm:$0xff] %vm562_vm1, %v1675_v18 }
 0xca3   : > { %2178 = shalt.err (!%p2175_p5)
}
 0xca4   : > { %s2179_s0 = scalar_lea.hbm %s2621_s3, 128  ;;  %s2183_s21 = scalar_lea.hbm %s2683_s14, 256 }
 0xca5   : > { %p2180_p6 = scmp.ne.s32.totalorder %s2621_s3, %s2179_s0  ;;  %p2184_p10 = scmp.lt.u32.totalorder %s2621_s3, %s2683_s14 }
 0xca6   : > { %p2185_p11 = scmp.lt.u32.totalorder %s2183_s21, %s2179_s0  ;;  %p2187_p13 = scmp.lt.u32.totalorder %s2179_s0, %s2621_s3 }
 0xca7   : > { %p2181_p7 = pnand %p2180_p6, %p2366_p4 }
 0xca8   : > { %p2186_p12 = por %p2185_p11, %p2184_p10 }
 0xca9   : > { %p2182_p9 = pneg %p2181_p7 }
 0xcaa   : > { %p2188_p0 = por %p2187_p13, %p2186_p12 }
 0xcac   : > { %p2189_p1 = pnand %p2188_p0, %p2182_p9 }
 0xcae   : > { %2192 = shalt.err (!%p2189_p1)
}
 0xcaf   : > { %2061 = dma.vmem_to_hbm [thread:$0]  (%p2366_p4), %s2623_s20, 128, %s2621_s3, %s1678_s28  }
 0xcb0 PF: > { %p2067_p2 = scmp.ge.s32.totalorder %s2243_s18, 2  ;;  %s1703_s1 = sand.u32 1, %s2223_s29  }
 0xcb1   : > { %s1704_s16 = scalar_lea.sflag [#allocation4], %s1703_s1 }
 0xcb2   : > { %p2064_p3 = pnand %p2067_p2, %p2373_p8 }
 0xcb4   : > { %2218 = dma.done.wait (!%p2064_p3), %s1704_s16, 128  }
 0xcb5   : > { %2220 = vsyncadd (!%p2064_p3), %s1704_s16, 4294967168  ;;  %s27_s18 = sadd.s32 1, %s2243_s18   ;;  %s2698_s16 = sld [smem:[#allocation6_spill]] }
 0xcb6   : > { %p24_p5 = scmp.ge.s32.totalorder %s27_s18, 4   ;;  %s2699_s17 = sld [smem:[#allocation7_spill]] }
 0xcb7   : > { %s2700_s29 = smov %s2227_s30  ;;  %s2701_s30 = smov %s2231_s15 }
 0xcb8   : > { %s2702_s15 = smov %s2379_s26  ;;  %26 = sbr.rel (!%p24_p5) target bundleno = 9 (0x9), region = 131 }
 0xcbf   :  { %1709 = vsyncpa [#allocation4], 1 }
 0xcc0   :  { %1711 = vsyncpa [#allocation4 + $0x1], 1 }

</bundles_post_ra>
